<compile_context>
chip_gen: v6e
topology: v6e:2x2x1
jax: 0.10.0
libtpu: 0.0.40
codegen_flags: <defaults>
</compile_context>

<pallas_src>
import numpy as np
import jax
import jax.numpy as jnp
from jax.experimental import pallas as pl
from jax.experimental.pallas import tpu as pltpu


def _ceil_to(v, m):
    return ((v + m - 1) // m) * m


def unet_innermost_forward(x, w_down, w_up, gamma, beta):
    """x: [N, input_nc, H, W] (NCHW). Returns [N, input_nc + outer_nc, H, W]."""
    N, C_in, H, W = x.shape
    C_h = w_down.shape[0]              # Conv2d weight          [inner, in, 4, 4]
    C_out = w_up.shape[1]              # ConvTranspose2d weight [inner, outer, 4, 4]
    OH = H // 2
    PW = 2 * W                         # row pitch of every flattened spatial buffer
    LW = OH * PW                       # == H*W ; flat length of one image plane
    LPAD = _ceil_to((OH + 2) * PW + 4, 128)       # padded flat length of parity planes
    HOFF = max(128, _ceil_to(PW, 128))            # lane-aligned start of h in dilated buf
    HPITCH = _ceil_to(HOFF + LW + W + 4, 128)     # per-image pitch of dilated-h buffer
    f32 = jnp.float32

    # ------------------- batch blocking: NB images per grid step ---------------------
    # Per-image scratch + double-buffered block bytes (f32); budget kept well inside
    # v7x's 64 MiB physical VMEM (v5e/v6e have 128 MiB).
    per_img = 4 * (16 * C_in * LW                 # pd   (down-conv im2col patches)
                   + 16 * C_h * LW                # pu   (up-conv patches, both phases)
                   + C_h * HPITCH                 # hdf  (column-dilated h)
                   + 2 * (4 * C_in * LPAD)        # double-buffered x parity/shift planes
                   + 2 * (C_out * LW)             # double-buffered y_pre block
                   + 2 * ((C_in + C_out) * LW + C_in * LW))   # kernel-2 blocks
    budget = 20 * (1 << 20)
    NB = max(1, min(N, 32, budget // per_img))
    if N >= 8:
        NB = max(1, min(NB, N // 4))   # keep >=4 grid steps (>=2 per v7x TensorCore)
    G = -(-N // NB)                    # grid steps
    Npad = G * NB

    const_bytes = 4 * 2 * (C_h * 16 * C_in + 2 * C_out * 16 * C_h + 4 * NB * LW)
    vmem_limit = int(min(56 * (1 << 20),
                         max(32 * (1 << 20), 2 * (NB * per_img + const_bytes))))

    # -------------------- wrapper-side layout prep (all ~1x data) --------------------
    # Pad the batch to a multiple of NB (zero images contribute exactly zero to the BN
    # partial sums, so stats stay exact), pad spatially by 1, split rows by parity and
    # also emit a 1-lane-shifted copy of each parity plane so every down-conv tap *pair*
    # is a single contiguous 8-row lane slice inside the kernel.
    xb = jnp.pad(x.astype(f32), ((0, Npad - N), (0, 0), (0, 0), (0, 0)))
    xpad = jnp.pad(xb, ((0, 0), (0, 0), (1, 1), (1, 1)))          # [Npad,Cin,H+2,W+2]

    def parity_plane(xp):                          # [Npad,Cin,OH+1,W+2] -> [Npad,Cin,LPAD]
        p = jnp.pad(xp, ((0, 0), (0, 0), (1, 0), (0, PW - (W + 2))))
        p = p.reshape(Npad, C_in, (OH + 2) * PW)
        return jnp.pad(p, ((0, 0), (0, 0), (0, LPAD - (OH + 2) * PW)))

    groups = []
    for ph in range(2):
        plane = parity_plane(xpad[:, :, ph::2, :])
        shifted = jnp.pad(plane[:, :, 1:], ((0, 0), (0, 0), (0, 1)))   # plane << 1 lane
        groups.append(jnp.concatenate([plane, shifted], axis=1))       # [Npad,2*Cin,LPAD]
    xdf = jnp.concatenate(groups, axis=1)                              # [Npad,4*Cin,LPAD]

    # Down-conv weights stacked to one [C_h, 16*C_in] matrix; column-block order is
    # (row-parity ph, row-tap a, col-tap kw, ci) with kh = 2a + ph.
    wd_r = w_down.astype(f32).reshape(C_h, C_in, 2, 2, 4)              # [co,ci,a,ph,kw]
    wd_stacked = wd_r.transpose(0, 3, 2, 4, 1).reshape(C_h, 16 * C_in)

    # Transpose-conv weights for the two output-row phases, fused into one block-diagonal
    # [2*C_out, 16*C_h] LHS so the whole up-conv is a single K=16*C_h matmul.
    phase_blocks = []
    for dr in range(2):
        per = []
        for a in range(2):
            kh = 3 - 2 * a if dr == 0 else 2 - 2 * a
            for kwp in range(4):
                per.append(w_up.astype(f32)[:, :, kh, 3 - kwp].T)      # [C_out, C_h]
        phase_blocks.append(jnp.concatenate(per, axis=1))              # [C_out, 8*C_h]
    zblk = jnp.zeros((C_out, 8 * C_h), f32)
    wu_blk = jnp.concatenate(
        [jnp.concatenate([phase_blocks[0], zblk], axis=1),
         jnp.concatenate([zblk, phase_blocks[1]], axis=1)], axis=0)    # [2*C_out,16*C_h]

    # Compile-time column masks over the NB*LW lane axis; the per-image pattern has
    # period PW and LW % PW == 0, so it tiles across the images stacked along lanes.
    s = np.arange(NB * LW) % PW
    mask_hd = jnp.asarray(((s % 2 == 0) & (s >= 2) & (s <= W))
                          .astype(np.float32).reshape(1, NB * LW))
    mask_half = jnp.asarray((s < W).astype(np.float32).reshape(1, NB * LW))

    # ------------------------------ kernel 1: fused block ----------------------------
    def fused_kernel(xp_ref, wd_ref, wu_ref, mhd_ref, mhf_ref,
                     y_ref, st_ref, pd_ref, hdf_ref, pu_ref):
        # ---- stage down-conv patches: LeakyReLU fused, 8-row full-tile aligned stores.
        for nb in range(NB):
            lo = nb * LW
            for ph in range(2):
                for a in range(2):
                    for j in range(2):                      # kw tap pair (2j, 2j+1)
                        off = (a + 1) * PW + 2 * j - 2
                        pair = xp_ref[nb, ph * 2 * C_in:(ph + 1) * 2 * C_in,
                                      off:off + LW]         # rows = [kw=2j ; kw=2j+1] taps
                        pair = jnp.where(pair >= 0.0, pair, 0.2 * pair)   # LeakyReLU(0.2)
                        row = ((ph * 2 + a) * 4 + 2 * j) * C_in           # multiple of 8
                        pd_ref[row:row + 2 * C_in, lo:lo + LW] = pair

        # ---- one down-conv matmul over the whole image block (lane dim = NB*LW). ----
        hwide = jnp.dot(wd_ref[...], pd_ref[...], preferred_element_type=jnp.float32)
        hwide = jnp.maximum(hwide, 0.0) * mhd_ref[...]      # uprelu + zero dilation cols

        # ---- h into the zero-bordered, column-dilated VMEM buffer (aligned stores). ---
        for nb in range(NB):
            hb = nb * HPITCH
            hdf_ref[:, hb:hb + HOFF] = jnp.zeros((C_h, HOFF), f32)
            hdf_ref[:, hb + HOFF + LW:hb + HPITCH] = (
                jnp.zeros((C_h, HPITCH - HOFF - LW), f32))
            hdf_ref[:, hb + HOFF:hb + HOFF + LW] = hwide[:, nb * LW:(nb + 1) * LW]

        # ---- stage up-conv patches for both output-row phases (8-row aligned). -------
        for nb in range(NB):
            lo = nb * LW
            hb = nb * HPITCH + (HOFF - PW)
            for dr in range(2):
                for a in range(2):
                    for kwp in range(4):
                        off = hb + (dr + a) * PW + kwp - dr * W
                        row = (dr * 8 + a * 4 + kwp) * C_h
                        pu_ref[row:row + C_h, lo:lo + LW] = hdf_ref[:, off:off + LW]

        # ---- single fused (block-diagonal) up-conv matmul, K = 16*C_h. ---------------
        yy = jnp.dot(wu_ref[...], pu_ref[...], preferred_element_type=jnp.float32)
        keep0 = mhf_ref[...] > 0.5
        y_dense = jnp.where(keep0, yy[:C_out, :], yy[C_out:, :])   # [C_out, NB*LW], NCHW-flat

        y_ref[0] = y_dense
        # Per-step partial BatchNorm statistics, merged into one store.
        st_ref[0] = jnp.concatenate(
            [jnp.sum(y_dense, axis=1, keepdims=True),
             jnp.sum(y_dense * y_dense, axis=1, keepdims=True)], axis=1)

    cparams = pltpu.CompilerParams(dimension_semantics=("parallel",),
                                   vmem_limit_bytes=vmem_limit)

    y_pre, stats = pl.pallas_call(
        fused_kernel,
        out_shape=(jax.ShapeDtypeStruct((G, C_out, NB * LW), f32),
                   jax.ShapeDtypeStruct((G, C_out, 2), f32)),
        grid=(G,),
        in_specs=[
            pl.BlockSpec((NB, 4 * C_in, LPAD), lambda g: (g, 0, 0)),
            pl.BlockSpec((C_h, 16 * C_in), lambda g: (0, 0)),
            pl.BlockSpec((2 * C_out, 16 * C_h), lambda g: (0, 0)),
            pl.BlockSpec((1, NB * LW), lambda g: (0, 0)),
            pl.BlockSpec((1, NB * LW), lambda g: (0, 0)),
        ],
        out_specs=(pl.BlockSpec((1, C_out, NB * LW), lambda g: (g, 0, 0)),
                   pl.BlockSpec((1, C_out, 2), lambda g: (g, 0, 0))),
        scratch_shapes=[pltpu.VMEM((16 * C_in, NB * LW), f32),   # stacked down-conv patches
                        pltpu.VMEM((C_h, NB * HPITCH), f32),     # padded, column-dilated h
                        pltpu.VMEM((16 * C_h, NB * LW), f32)],   # stacked up-conv patches
        compiler_params=cparams,
    )(xdf, wd_stacked, wu_blk, mask_hd, mask_half)

    # -------- finalize train-mode BatchNorm stats (tiny) and fold into scale/shift ----
    cnt = jnp.float32(N * H * W)                 # padded images contribute exact zeros
    ssum = jnp.sum(stats[:, :, 0], axis=0)
    ssq = jnp.sum(stats[:, :, 1], axis=0)
    mean = ssum / cnt
    var = ssq / cnt - mean * mean                # biased variance (PyTorch train-mode BN)
    # TODO(synk): E[y^2]-mean^2 in f32 can cancel badly at production activation
    # magnitudes; switch to a shifted / Welford-style combine of the partials there.
    scale = (gamma.astype(f32) * jax.lax.rsqrt(var + 1e-5)).reshape(C_out, 1)
    shift = (beta.astype(f32) - mean * scale[:, 0]).reshape(C_out, 1)
    # TODO(synk): PyTorch train-mode BN also updates running_mean/running_var buffers;
    # that module state is not part of the returned tensor and is not produced here.

    # -------------------- kernel 2: BN apply + skip concat (batched) ------------------
    x_flat = xb.reshape(Npad, C_in, H * W)

    def bn_concat_kernel(x_ref, yp_ref, sc_ref, sh_ref, o_ref):
        sc = sc_ref[...]
        sh = sh_ref[...]
        for nb in range(NB):
            yb = yp_ref[0, :, nb * LW:(nb + 1) * LW] * sc + sh
            o_ref[nb] = jnp.concatenate([x_ref[nb], yb], axis=0)   # one full-tile store

    out_flat = pl.pallas_call(
        bn_concat_kernel,
        out_shape=jax.ShapeDtypeStruct((Npad, C_in + C_out, H * W), f32),
        grid=(G,),
        in_specs=[
            pl.BlockSpec((NB, C_in, H * W), lambda g: (g, 0, 0)),
            pl.BlockSpec((1, C_out, NB * LW), lambda g: (g, 0, 0)),
            pl.BlockSpec((C_out, 1), lambda g: (0, 0)),
            pl.BlockSpec((C_out, 1), lambda g: (0, 0)),
        ],
        out_specs=pl.BlockSpec((NB, C_in + C_out, H * W), lambda g: (g, 0, 0)),
        compiler_params=cparams,
    )(x_flat, y_pre, scale, shift)

    return out_flat[:N].reshape(N, C_in + C_out, H, W)


# ------------------------------- pure-JAX reference ----------------------------------
def _reference(x, w_down, w_up, gamma, beta):
    xl = jnp.where(x >= 0, x, 0.2 * x)
    h = jax.lax.conv_general_dilated(
        xl, w_down, (2, 2), ((1, 1), (1, 1)),
        dimension_numbers=('NCHW', 'OIHW', 'NCHW'))
    h = jnp.maximum(h, 0.0)
    w_conv = jnp.flip(w_up, axis=(2, 3)).transpose(1, 0, 2, 3)
    y = jax.lax.conv_general_dilated(
        h, w_conv, (1, 1), ((2, 2), (2, 2)), lhs_dilation=(2, 2),
        dimension_numbers=('NCHW', 'OIHW', 'NCHW'))
    mean = y.mean(axis=(0, 2, 3), keepdims=True)
    var = ((y - mean) ** 2).mean(axis=(0, 2, 3), keepdims=True)
    y = (y - mean) * jax.lax.rsqrt(var + 1e-5)
    y = y * gamma.reshape(1, -1, 1, 1) + beta.reshape(1, -1, 1, 1)
    return jnp.concatenate([x, y], axis=1)


# --------------------------------------- main ----------------------------------------
if __name__ == "__main__":
    outer_nc, inner_nc = 4, 8
    N, H, W = 2, 16, 16

    key = jax.random.PRNGKey(0)
    kx, kd, ku, kg, kb = jax.random.split(key, 5)
    x = jax.random.normal(kx, (N, outer_nc, H, W), dtype=jnp.float32)
    # Conv2d(input_nc=4, inner_nc=8, k=4, bias=False) / ConvTranspose2d(8, 4, k=4, bias=False)
    w_down = 0.1 * jax.random.normal(kd, (inner_nc, outer_nc, 4, 4), dtype=jnp.float32)
    w_up = 0.1 * jax.random.normal(ku, (inner_nc, outer_nc, 4, 4), dtype=jnp.float32)
    # BatchNorm2d(outer_nc) affine parameters
    gamma = 1.0 + 0.1 * jax.random.normal(kg, (outer_nc,), dtype=jnp.float32)
    beta = 0.1 * jax.random.normal(kb, (outer_nc,), dtype=jnp.float32)

    fwd = jax.jit(unet_innermost_forward)
    out = jax.block_until_ready(fwd(x, w_down, w_up, gamma, beta))

    ref = jax.block_until_ready(_reference(x, w_down, w_up, gamma, beta))
    assert out.shape == (N, 2 * outer_nc, H, W), out.shape
    max_err = float(jnp.max(jnp.abs(out - ref)))
    assert jnp.allclose(out, ref, atol=1e-3, rtol=1e-3), max_err

    print("KERNEL_OK")
</pallas_src>

<mosaic_0001>
module attributes {stable_mosaic.version = 11 : i64} {
  func.func @fused_kernel(%arg0: i32, %arg1: memref<2x16x384xf32, #tpu.memory_space<vmem>>, %arg2: memref<8x64xf32, #tpu.memory_space<vmem>>, %arg3: memref<8x128xf32, #tpu.memory_space<vmem>>, %arg4: memref<1x512xf32, #tpu.memory_space<vmem>>, %arg5: memref<1x512xf32, #tpu.memory_space<vmem>>, %arg6: memref<1x4x512xf32, #tpu.memory_space<vmem>>, %arg7: memref<1x4x2xf32, #tpu.memory_space<vmem>>, %arg8: memref<64x512xf32, #tpu.memory_space<vmem>>, %arg9: memref<8x1024xf32, #tpu.memory_space<vmem>>, %arg10: memref<128x512xf32, #tpu.memory_space<vmem>>) attributes {dimension_semantics = [#tpu.dimension_semantics<parallel>], iteration_bounds = array<i64: 1>, scalar_prefetch = 0 : i64, scratch_operands = 3 : i64, tpu.core_type = #tpu.core_type<tc>, window_params = [{transform_indices = @transform_0, window_bounds = array<i64: 2, 16, 384>}, {pipeline_mode = #tpu.pipeline_mode<synchronous>, transform_indices = @transform_1, window_bounds = array<i64: 8, 64>}, {pipeline_mode = #tpu.pipeline_mode<synchronous>, transform_indices = @transform_2, window_bounds = array<i64: 8, 128>}, {pipeline_mode = #tpu.pipeline_mode<synchronous>, transform_indices = @transform_3, window_bounds = array<i64: 1, 512>}, {pipeline_mode = #tpu.pipeline_mode<synchronous>, transform_indices = @transform_4, window_bounds = array<i64: 1, 512>}, {transform_indices = @transform_5, window_bounds = array<i64: 1, 4, 512>}, {transform_indices = @transform_6, window_bounds = array<i64: 1, 4, 2>}]} {
    %c0 = arith.constant 0 : index
    %c0_0 = arith.constant 0 : index
    %c30 = arith.constant 30 : index
    %0 = vector.load %arg1[%c0, %c0_0, %c30] : memref<2x16x384xf32, #tpu.memory_space<vmem>>, vector<1x8x256xf32>
    %1 = vector.shape_cast %0 : vector<1x8x256xf32> to vector<8x256xf32>
    %cst = arith.constant 0.000000e+00 : f32
    %2 = vector.broadcast %cst : f32 to vector<8x256xf32>
    %3 = arith.cmpf oge, %1, %2 : vector<8x256xf32>
    %cst_1 = arith.constant 2.000000e-01 : f32
    %4 = vector.broadcast %cst_1 : f32 to vector<8x256xf32>
    %5 = arith.mulf %4, %1 : vector<8x256xf32>
    %6 = arith.select %3, %1, %5 : vector<8x256xi1>, vector<8x256xf32>
    %c0_2 = arith.constant 0 : index
    %c0_3 = arith.constant 0 : index
    %7 = vector.load %arg8[%c0_2, %c0_3] : memref<64x512xf32, #tpu.memory_space<vmem>>, vector<8x256xf32>
    tpu.vector_store %arg8[%c0_2, %c0_3], %6 {strides = array<i32>} : memref<64x512xf32, #tpu.memory_space<vmem>>, vector<8x256xf32>,
    %c0_4 = arith.constant 0 : index
    %c0_5 = arith.constant 0 : index
    %c32 = arith.constant 32 : index
    %8 = vector.load %arg1[%c0_4, %c0_5, %c32] : memref<2x16x384xf32, #tpu.memory_space<vmem>>, vector<1x8x256xf32>
    %9 = vector.shape_cast %8 : vector<1x8x256xf32> to vector<8x256xf32>
    %cst_6 = arith.constant 0.000000e+00 : f32
    %10 = vector.broadcast %cst_6 : f32 to vector<8x256xf32>
    %11 = arith.cmpf oge, %9, %10 : vector<8x256xf32>
    %cst_7 = arith.constant 2.000000e-01 : f32
    %12 = vector.broadcast %cst_7 : f32 to vector<8x256xf32>
    %13 = arith.mulf %12, %9 : vector<8x256xf32>
    %14 = arith.select %11, %9, %13 : vector<8x256xi1>, vector<8x256xf32>
    %c8 = arith.constant 8 : index
    %c0_8 = arith.constant 0 : index
    %15 = vector.load %arg8[%c8, %c0_8] : memref<64x512xf32, #tpu.memory_space<vmem>>, vector<8x256xf32>
    tpu.vector_store %arg8[%c8, %c0_8], %14 {strides = array<i32>} : memref<64x512xf32, #tpu.memory_space<vmem>>, vector<8x256xf32>,
    %c0_9 = arith.constant 0 : index
    %c0_10 = arith.constant 0 : index
    %c62 = arith.constant 62 : index
    %16 = vector.load %arg1[%c0_9, %c0_10, %c62] : memref<2x16x384xf32, #tpu.memory_space<vmem>>, vector<1x8x256xf32>
    %17 = vector.shape_cast %16 : vector<1x8x256xf32> to vector<8x256xf32>
    %cst_11 = arith.constant 0.000000e+00 : f32
    %18 = vector.broadcast %cst_11 : f32 to vector<8x256xf32>
    %19 = arith.cmpf oge, %17, %18 : vector<8x256xf32>
    %cst_12 = arith.constant 2.000000e-01 : f32
    %20 = vector.broadcast %cst_12 : f32 to vector<8x256xf32>
    %21 = arith.mulf %20, %17 : vector<8x256xf32>
    %22 = arith.select %19, %17, %21 : vector<8x256xi1>, vector<8x256xf32>
    %c16 = arith.constant 16 : index
    %c0_13 = arith.constant 0 : index
    %23 = vector.load %arg8[%c16, %c0_13] : memref<64x512xf32, #tpu.memory_space<vmem>>, vector<8x256xf32>
    tpu.vector_store %arg8[%c16, %c0_13], %22 {strides = array<i32>} : memref<64x512xf32, #tpu.memory_space<vmem>>, vector<8x256xf32>,
    %c0_14 = arith.constant 0 : index
    %c0_15 = arith.constant 0 : index
    %c64 = arith.constant 64 : index
    %24 = vector.load %arg1[%c0_14, %c0_15, %c64] : memref<2x16x384xf32, #tpu.memory_space<vmem>>, vector<1x8x256xf32>
    %25 = vector.shape_cast %24 : vector<1x8x256xf32> to vector<8x256xf32>
    %cst_16 = arith.constant 0.000000e+00 : f32
    %26 = vector.broadcast %cst_16 : f32 to vector<8x256xf32>
    %27 = arith.cmpf oge, %25, %26 : vector<8x256xf32>
    %cst_17 = arith.constant 2.000000e-01 : f32
    %28 = vector.broadcast %cst_17 : f32 to vector<8x256xf32>
    %29 = arith.mulf %28, %25 : vector<8x256xf32>
    %30 = arith.select %27, %25, %29 : vector<8x256xi1>, vector<8x256xf32>
    %c24 = arith.constant 24 : index
    %c0_18 = arith.constant 0 : index
    %31 = vector.load %arg8[%c24, %c0_18] : memref<64x512xf32, #tpu.memory_space<vmem>>, vector<8x256xf32>
    tpu.vector_store %arg8[%c24, %c0_18], %30 {strides = array<i32>} : memref<64x512xf32, #tpu.memory_space<vmem>>, vector<8x256xf32>,
    %c0_19 = arith.constant 0 : index
    %c8_20 = arith.constant 8 : index
    %c30_21 = arith.constant 30 : index
    %32 = vector.load %arg1[%c0_19, %c8_20, %c30_21] : memref<2x16x384xf32, #tpu.memory_space<vmem>>, vector<1x8x256xf32>
    %33 = vector.shape_cast %32 : vector<1x8x256xf32> to vector<8x256xf32>
    %cst_22 = arith.constant 0.000000e+00 : f32
    %34 = vector.broadcast %cst_22 : f32 to vector<8x256xf32>
    %35 = arith.cmpf oge, %33, %34 : vector<8x256xf32>
    %cst_23 = arith.constant 2.000000e-01 : f32
    %36 = vector.broadcast %cst_23 : f32 to vector<8x256xf32>
    %37 = arith.mulf %36, %33 : vector<8x256xf32>
    %38 = arith.select %35, %33, %37 : vector<8x256xi1>, vector<8x256xf32>
    %c32_24 = arith.constant 32 : index
    %c0_25 = arith.constant 0 : index
    %39 = vector.load %arg8[%c32_24, %c0_25] : memref<64x512xf32, #tpu.memory_space<vmem>>, vector<8x256xf32>
    tpu.vector_store %arg8[%c32_24, %c0_25], %38 {strides = array<i32>} : memref<64x512xf32, #tpu.memory_space<vmem>>, vector<8x256xf32>,
    %c0_26 = arith.constant 0 : index
    %c8_27 = arith.constant 8 : index
    %c32_28 = arith.constant 32 : index
    %40 = vector.load %arg1[%c0_26, %c8_27, %c32_28] : memref<2x16x384xf32, #tpu.memory_space<vmem>>, vector<1x8x256xf32>
    %41 = vector.shape_cast %40 : vector<1x8x256xf32> to vector<8x256xf32>
    %cst_29 = arith.constant 0.000000e+00 : f32
    %42 = vector.broadcast %cst_29 : f32 to vector<8x256xf32>
    %43 = arith.cmpf oge, %41, %42 : vector<8x256xf32>
    %cst_30 = arith.constant 2.000000e-01 : f32
    %44 = vector.broadcast %cst_30 : f32 to vector<8x256xf32>
    %45 = arith.mulf %44, %41 : vector<8x256xf32>
    %46 = arith.select %43, %41, %45 : vector<8x256xi1>, vector<8x256xf32>
    %c40 = arith.constant 40 : index
    %c0_31 = arith.constant 0 : index
    %47 = vector.load %arg8[%c40, %c0_31] : memref<64x512xf32, #tpu.memory_space<vmem>>, vector<8x256xf32>
    tpu.vector_store %arg8[%c40, %c0_31], %46 {strides = array<i32>} : memref<64x512xf32, #tpu.memory_space<vmem>>, vector<8x256xf32>,
    %c0_32 = arith.constant 0 : index
    %c8_33 = arith.constant 8 : index
    %c62_34 = arith.constant 62 : index
    %48 = vector.load %arg1[%c0_32, %c8_33, %c62_34] : memref<2x16x384xf32, #tpu.memory_space<vmem>>, vector<1x8x256xf32>
    %49 = vector.shape_cast %48 : vector<1x8x256xf32> to vector<8x256xf32>
    %cst_35 = arith.constant 0.000000e+00 : f32
    %50 = vector.broadcast %cst_35 : f32 to vector<8x256xf32>
    %51 = arith.cmpf oge, %49, %50 : vector<8x256xf32>
    %cst_36 = arith.constant 2.000000e-01 : f32
    %52 = vector.broadcast %cst_36 : f32 to vector<8x256xf32>
    %53 = arith.mulf %52, %49 : vector<8x256xf32>
    %54 = arith.select %51, %49, %53 : vector<8x256xi1>, vector<8x256xf32>
    %c48 = arith.constant 48 : index
    %c0_37 = arith.constant 0 : index
    %55 = vector.load %arg8[%c48, %c0_37] : memref<64x512xf32, #tpu.memory_space<vmem>>, vector<8x256xf32>
    tpu.vector_store %arg8[%c48, %c0_37], %54 {strides = array<i32>} : memref<64x512xf32, #tpu.memory_space<vmem>>, vector<8x256xf32>,
    %c0_38 = arith.constant 0 : index
    %c8_39 = arith.constant 8 : index
    %c64_40 = arith.constant 64 : index
    %56 = vector.load %arg1[%c0_38, %c8_39, %c64_40] : memref<2x16x384xf32, #tpu.memory_space<vmem>>, vector<1x8x256xf32>
    %57 = vector.shape_cast %56 : vector<1x8x256xf32> to vector<8x256xf32>
    %cst_41 = arith.constant 0.000000e+00 : f32
    %58 = vector.broadcast %cst_41 : f32 to vector<8x256xf32>
    %59 = arith.cmpf oge, %57, %58 : vector<8x256xf32>
    %cst_42 = arith.constant 2.000000e-01 : f32
    %60 = vector.broadcast %cst_42 : f32 to vector<8x256xf32>
    %61 = arith.mulf %60, %57 : vector<8x256xf32>
    %62 = arith.select %59, %57, %61 : vector<8x256xi1>, vector<8x256xf32>
    %c56 = arith.constant 56 : index
    %c0_43 = arith.constant 0 : index
    %63 = vector.load %arg8[%c56, %c0_43] : memref<64x512xf32, #tpu.memory_space<vmem>>, vector<8x256xf32>
    tpu.vector_store %arg8[%c56, %c0_43], %62 {strides = array<i32>} : memref<64x512xf32, #tpu.memory_space<vmem>>, vector<8x256xf32>,
    %c1 = arith.constant 1 : index
    %c0_44 = arith.constant 0 : index
    %c30_45 = arith.constant 30 : index
    %64 = vector.load %arg1[%c1, %c0_44, %c30_45] : memref<2x16x384xf32, #tpu.memory_space<vmem>>, vector<1x8x256xf32>
    %65 = vector.shape_cast %64 : vector<1x8x256xf32> to vector<8x256xf32>
    %cst_46 = arith.constant 0.000000e+00 : f32
    %66 = vector.broadcast %cst_46 : f32 to vector<8x256xf32>
    %67 = arith.cmpf oge, %65, %66 : vector<8x256xf32>
    %cst_47 = arith.constant 2.000000e-01 : f32
    %68 = vector.broadcast %cst_47 : f32 to vector<8x256xf32>
    %69 = arith.mulf %68, %65 : vector<8x256xf32>
    %70 = arith.select %67, %65, %69 : vector<8x256xi1>, vector<8x256xf32>
    %c0_48 = arith.constant 0 : index
    %c256 = arith.constant 256 : index
    %71 = vector.load %arg8[%c0_48, %c256] : memref<64x512xf32, #tpu.memory_space<vmem>>, vector<8x256xf32>
    tpu.vector_store %arg8[%c0_48, %c256], %70 {strides = array<i32>} : memref<64x512xf32, #tpu.memory_space<vmem>>, vector<8x256xf32>,
    %c1_49 = arith.constant 1 : index
    %c0_50 = arith.constant 0 : index
    %c32_51 = arith.constant 32 : index
    %72 = vector.load %arg1[%c1_49, %c0_50, %c32_51] : memref<2x16x384xf32, #tpu.memory_space<vmem>>, vector<1x8x256xf32>
    %73 = vector.shape_cast %72 : vector<1x8x256xf32> to vector<8x256xf32>
    %cst_52 = arith.constant 0.000000e+00 : f32
    %74 = vector.broadcast %cst_52 : f32 to vector<8x256xf32>
    %75 = arith.cmpf oge, %73, %74 : vector<8x256xf32>
    %cst_53 = arith.constant 2.000000e-01 : f32
    %76 = vector.broadcast %cst_53 : f32 to vector<8x256xf32>
    %77 = arith.mulf %76, %73 : vector<8x256xf32>
    %78 = arith.select %75, %73, %77 : vector<8x256xi1>, vector<8x256xf32>
    %c8_54 = arith.constant 8 : index
    %c256_55 = arith.constant 256 : index
    %79 = vector.load %arg8[%c8_54, %c256_55] : memref<64x512xf32, #tpu.memory_space<vmem>>, vector<8x256xf32>
    tpu.vector_store %arg8[%c8_54, %c256_55], %78 {strides = array<i32>} : memref<64x512xf32, #tpu.memory_space<vmem>>, vector<8x256xf32>,
    %c1_56 = arith.constant 1 : index
    %c0_57 = arith.constant 0 : index
    %c62_58 = arith.constant 62 : index
    %80 = vector.load %arg1[%c1_56, %c0_57, %c62_58] : memref<2x16x384xf32, #tpu.memory_space<vmem>>, vector<1x8x256xf32>
    %81 = vector.shape_cast %80 : vector<1x8x256xf32> to vector<8x256xf32>
    %cst_59 = arith.constant 0.000000e+00 : f32
    %82 = vector.broadcast %cst_59 : f32 to vector<8x256xf32>
    %83 = arith.cmpf oge, %81, %82 : vector<8x256xf32>
    %cst_60 = arith.constant 2.000000e-01 : f32
    %84 = vector.broadcast %cst_60 : f32 to vector<8x256xf32>
    %85 = arith.mulf %84, %81 : vector<8x256xf32>
    %86 = arith.select %83, %81, %85 : vector<8x256xi1>, vector<8x256xf32>
    %c16_61 = arith.constant 16 : index
    %c256_62 = arith.constant 256 : index
    %87 = vector.load %arg8[%c16_61, %c256_62] : memref<64x512xf32, #tpu.memory_space<vmem>>, vector<8x256xf32>
    tpu.vector_store %arg8[%c16_61, %c256_62], %86 {strides = array<i32>} : memref<64x512xf32, #tpu.memory_space<vmem>>, vector<8x256xf32>,
    %c1_63 = arith.constant 1 : index
    %c0_64 = arith.constant 0 : index
    %c64_65 = arith.constant 64 : index
    %88 = vector.load %arg1[%c1_63, %c0_64, %c64_65] : memref<2x16x384xf32, #tpu.memory_space<vmem>>, vector<1x8x256xf32>
    %89 = vector.shape_cast %88 : vector<1x8x256xf32> to vector<8x256xf32>
    %cst_66 = arith.constant 0.000000e+00 : f32
    %90 = vector.broadcast %cst_66 : f32 to vector<8x256xf32>
    %91 = arith.cmpf oge, %89, %90 : vector<8x256xf32>
    %cst_67 = arith.constant 2.000000e-01 : f32
    %92 = vector.broadcast %cst_67 : f32 to vector<8x256xf32>
    %93 = arith.mulf %92, %89 : vector<8x256xf32>
    %94 = arith.select %91, %89, %93 : vector<8x256xi1>, vector<8x256xf32>
    %c24_68 = arith.constant 24 : index
    %c256_69 = arith.constant 256 : index
    %95 = vector.load %arg8[%c24_68, %c256_69] : memref<64x512xf32, #tpu.memory_space<vmem>>, vector<8x256xf32>
    tpu.vector_store %arg8[%c24_68, %c256_69], %94 {strides = array<i32>} : memref<64x512xf32, #tpu.memory_space<vmem>>, vector<8x256xf32>,
    %c1_70 = arith.constant 1 : index
    %c8_71 = arith.constant 8 : index
    %c30_72 = arith.constant 30 : index
    %96 = vector.load %arg1[%c1_70, %c8_71, %c30_72] : memref<2x16x384xf32, #tpu.memory_space<vmem>>, vector<1x8x256xf32>
    %97 = vector.shape_cast %96 : vector<1x8x256xf32> to vector<8x256xf32>
    %cst_73 = arith.constant 0.000000e+00 : f32
    %98 = vector.broadcast %cst_73 : f32 to vector<8x256xf32>
    %99 = arith.cmpf oge, %97, %98 : vector<8x256xf32>
    %cst_74 = arith.constant 2.000000e-01 : f32
    %100 = vector.broadcast %cst_74 : f32 to vector<8x256xf32>
    %101 = arith.mulf %100, %97 : vector<8x256xf32>
    %102 = arith.select %99, %97, %101 : vector<8x256xi1>, vector<8x256xf32>
    %c32_75 = arith.constant 32 : index
    %c256_76 = arith.constant 256 : index
    %103 = vector.load %arg8[%c32_75, %c256_76] : memref<64x512xf32, #tpu.memory_space<vmem>>, vector<8x256xf32>
    tpu.vector_store %arg8[%c32_75, %c256_76], %102 {strides = array<i32>} : memref<64x512xf32, #tpu.memory_space<vmem>>, vector<8x256xf32>,
    %c1_77 = arith.constant 1 : index
    %c8_78 = arith.constant 8 : index
    %c32_79 = arith.constant 32 : index
    %104 = vector.load %arg1[%c1_77, %c8_78, %c32_79] : memref<2x16x384xf32, #tpu.memory_space<vmem>>, vector<1x8x256xf32>
    %105 = vector.shape_cast %104 : vector<1x8x256xf32> to vector<8x256xf32>
    %cst_80 = arith.constant 0.000000e+00 : f32
    %106 = vector.broadcast %cst_80 : f32 to vector<8x256xf32>
    %107 = arith.cmpf oge, %105, %106 : vector<8x256xf32>
    %cst_81 = arith.constant 2.000000e-01 : f32
    %108 = vector.broadcast %cst_81 : f32 to vector<8x256xf32>
    %109 = arith.mulf %108, %105 : vector<8x256xf32>
    %110 = arith.select %107, %105, %109 : vector<8x256xi1>, vector<8x256xf32>
    %c40_82 = arith.constant 40 : index
    %c256_83 = arith.constant 256 : index
    %111 = vector.load %arg8[%c40_82, %c256_83] : memref<64x512xf32, #tpu.memory_space<vmem>>, vector<8x256xf32>
    tpu.vector_store %arg8[%c40_82, %c256_83], %110 {strides = array<i32>} : memref<64x512xf32, #tpu.memory_space<vmem>>, vector<8x256xf32>,
    %c1_84 = arith.constant 1 : index
    %c8_85 = arith.constant 8 : index
    %c62_86 = arith.constant 62 : index
    %112 = vector.load %arg1[%c1_84, %c8_85, %c62_86] : memref<2x16x384xf32, #tpu.memory_space<vmem>>, vector<1x8x256xf32>
    %113 = vector.shape_cast %112 : vector<1x8x256xf32> to vector<8x256xf32>
    %cst_87 = arith.constant 0.000000e+00 : f32
    %114 = vector.broadcast %cst_87 : f32 to vector<8x256xf32>
    %115 = arith.cmpf oge, %113, %114 : vector<8x256xf32>
    %cst_88 = arith.constant 2.000000e-01 : f32
    %116 = vector.broadcast %cst_88 : f32 to vector<8x256xf32>
    %117 = arith.mulf %116, %113 : vector<8x256xf32>
    %118 = arith.select %115, %113, %117 : vector<8x256xi1>, vector<8x256xf32>
    %c48_89 = arith.constant 48 : index
    %c256_90 = arith.constant 256 : index
    %119 = vector.load %arg8[%c48_89, %c256_90] : memref<64x512xf32, #tpu.memory_space<vmem>>, vector<8x256xf32>
    tpu.vector_store %arg8[%c48_89, %c256_90], %118 {strides = array<i32>} : memref<64x512xf32, #tpu.memory_space<vmem>>, vector<8x256xf32>,
    %c1_91 = arith.constant 1 : index
    %c8_92 = arith.constant 8 : index
    %c64_93 = arith.constant 64 : index
    %120 = vector.load %arg1[%c1_91, %c8_92, %c64_93] : memref<2x16x384xf32, #tpu.memory_space<vmem>>, vector<1x8x256xf32>
    %121 = vector.shape_cast %120 : vector<1x8x256xf32> to vector<8x256xf32>
    %cst_94 = arith.constant 0.000000e+00 : f32
    %122 = vector.broadcast %cst_94 : f32 to vector<8x256xf32>
    %123 = arith.cmpf oge, %121, %122 : vector<8x256xf32>
    %cst_95 = arith.constant 2.000000e-01 : f32
    %124 = vector.broadcast %cst_95 : f32 to vector<8x256xf32>
    %125 = arith.mulf %124, %121 : vector<8x256xf32>
    %126 = arith.select %123, %121, %125 : vector<8x256xi1>, vector<8x256xf32>
    %c56_96 = arith.constant 56 : index
    %c256_97 = arith.constant 256 : index
    %127 = vector.load %arg8[%c56_96, %c256_97] : memref<64x512xf32, #tpu.memory_space<vmem>>, vector<8x256xf32>
    tpu.vector_store %arg8[%c56_96, %c256_97], %126 {strides = array<i32>} : memref<64x512xf32, #tpu.memory_space<vmem>>, vector<8x256xf32>,
    %c0_98 = arith.constant 0 : index
    %c0_99 = arith.constant 0 : index
    %128 = vector.load %arg2[%c0_98, %c0_99] : memref<8x64xf32, #tpu.memory_space<vmem>>, vector<8x64xf32>
    %c0_100 = arith.constant 0 : index
    %c0_101 = arith.constant 0 : index
    %129 = vector.load %arg8[%c0_100, %c0_101] : memref<64x512xf32, #tpu.memory_space<vmem>>, vector<64x512xf32>
    %cst_102 = arith.constant dense<0.000000e+00> : vector<8x512xf32>
    %130 = tpu.matmul %128, %129, %cst_102 {dimension_numbers = #tpu.dot_dimension_numbers<[1], [0], [0], [1], [0, 0, 1, 1], [], []>} : vector<8x64xf32>, vector<64x512xf32>, vector<8x512xf32> -> vector<8x512xf32>
    %cst_103 = arith.constant 0.000000e+00 : f32
    %131 = vector.broadcast %cst_103 : f32 to vector<8x512xf32>
    %132 = arith.maximumf %130, %131 : vector<8x512xf32>
    %c0_104 = arith.constant 0 : index
    %c0_105 = arith.constant 0 : index
    %133 = vector.load %arg4[%c0_104, %c0_105] : memref<1x512xf32, #tpu.memory_space<vmem>>, vector<1x512xf32>
    %134 = vector.broadcast %133 : vector<1x512xf32> to vector<8x512xf32>
    %135 = arith.mulf %132, %134 : vector<8x512xf32>
    %cst_106 = arith.constant 0.000000e+00 : f32
    %136 = vector.broadcast %cst_106 : f32 to vector<8x128xf32>
    %c0_107 = arith.constant 0 : index
    %c0_108 = arith.constant 0 : index
    %137 = vector.load %arg9[%c0_107, %c0_108] : memref<8x1024xf32, #tpu.memory_space<vmem>>, vector<8x128xf32>
    tpu.vector_store %arg9[%c0_107, %c0_108], %136 {strides = array<i32>} : memref<8x1024xf32, #tpu.memory_space<vmem>>, vector<8x128xf32>,
    %cst_109 = arith.constant 0.000000e+00 : f32
    %138 = vector.broadcast %cst_109 : f32 to vector<8x128xf32>
    %c0_110 = arith.constant 0 : index
    %c384 = arith.constant 384 : index
    %139 = vector.load %arg9[%c0_110, %c384] : memref<8x1024xf32, #tpu.memory_space<vmem>>, vector<8x128xf32>
    tpu.vector_store %arg9[%c0_110, %c384], %138 {strides = array<i32>} : memref<8x1024xf32, #tpu.memory_space<vmem>>, vector<8x128xf32>,
    %140 = vector.extract_strided_slice %135 {offsets = [0, 0], sizes = [8, 256], strides = [1, 1]} : vector<8x512xf32> to vector<8x256xf32>
    %c0_111 = arith.constant 0 : index
    %c128 = arith.constant 128 : index
    %141 = vector.load %arg9[%c0_111, %c128] : memref<8x1024xf32, #tpu.memory_space<vmem>>, vector<8x256xf32>
    tpu.vector_store %arg9[%c0_111, %c128], %140 {strides = array<i32>} : memref<8x1024xf32, #tpu.memory_space<vmem>>, vector<8x256xf32>,
    %cst_112 = arith.constant 0.000000e+00 : f32
    %142 = vector.broadcast %cst_112 : f32 to vector<8x128xf32>
    %c0_113 = arith.constant 0 : index
    %c512 = arith.constant 512 : index
    %143 = vector.load %arg9[%c0_113, %c512] : memref<8x1024xf32, #tpu.memory_space<vmem>>, vector<8x128xf32>
    tpu.vector_store %arg9[%c0_113, %c512], %142 {strides = array<i32>} : memref<8x1024xf32, #tpu.memory_space<vmem>>, vector<8x128xf32>,
    %cst_114 = arith.constant 0.000000e+00 : f32
    %144 = vector.broadcast %cst_114 : f32 to vector<8x128xf32>
    %c0_115 = arith.constant 0 : index
    %c896 = arith.constant 896 : index
    %145 = vector.load %arg9[%c0_115, %c896] : memref<8x1024xf32, #tpu.memory_space<vmem>>, vector<8x128xf32>
    tpu.vector_store %arg9[%c0_115, %c896], %144 {strides = array<i32>} : memref<8x1024xf32, #tpu.memory_space<vmem>>, vector<8x128xf32>,
    %146 = vector.extract_strided_slice %135 {offsets = [0, 256], sizes = [8, 256], strides = [1, 1]} : vector<8x512xf32> to vector<8x256xf32>
    %c0_116 = arith.constant 0 : index
    %c640 = arith.constant 640 : index
    %147 = vector.load %arg9[%c0_116, %c640] : memref<8x1024xf32, #tpu.memory_space<vmem>>, vector<8x256xf32>
    tpu.vector_store %arg9[%c0_116, %c640], %146 {strides = array<i32>} : memref<8x1024xf32, #tpu.memory_space<vmem>>, vector<8x256xf32>,
    %c0_117 = arith.constant 0 : index
    %c96 = arith.constant 96 : index
    %148 = vector.load %arg9[%c0_117, %c96] : memref<8x1024xf32, #tpu.memory_space<vmem>>, vector<8x256xf32>
    %c0_118 = arith.constant 0 : index
    %c0_119 = arith.constant 0 : index
    %149 = vector.load %arg10[%c0_118, %c0_119] : memref<128x512xf32, #tpu.memory_space<vmem>>, vector<8x256xf32>
    tpu.vector_store %arg10[%c0_118, %c0_119], %148 {strides = array<i32>} : memref<128x512xf32, #tpu.memory_space<vmem>>, vector<8x256xf32>,
    %c0_120 = arith.constant 0 : index
    %c97 = arith.constant 97 : index
    %150 = vector.load %arg9[%c0_120, %c97] : memref<8x1024xf32, #tpu.memory_space<vmem>>, vector<8x256xf32>
    %c8_121 = arith.constant 8 : index
    %c0_122 = arith.constant 0 : index
    %151 = vector.load %arg10[%c8_121, %c0_122] : memref<128x512xf32, #tpu.memory_space<vmem>>, vector<8x256xf32>
    tpu.vector_store %arg10[%c8_121, %c0_122], %150 {strides = array<i32>} : memref<128x512xf32, #tpu.memory_space<vmem>>, vector<8x256xf32>,
    %c0_123 = arith.constant 0 : index
    %c98 = arith.constant 98 : index
    %152 = vector.load %arg9[%c0_123, %c98] : memref<8x1024xf32, #tpu.memory_space<vmem>>, vector<8x256xf32>
    %c16_124 = arith.constant 16 : index
    %c0_125 = arith.constant 0 : index
    %153 = vector.load %arg10[%c16_124, %c0_125] : memref<128x512xf32, #tpu.memory_space<vmem>>, vector<8x256xf32>
    tpu.vector_store %arg10[%c16_124, %c0_125], %152 {strides = array<i32>} : memref<128x512xf32, #tpu.memory_space<vmem>>, vector<8x256xf32>,
    %c0_126 = arith.constant 0 : index
    %c99 = arith.constant 99 : index
    %154 = vector.load %arg9[%c0_126, %c99] : memref<8x1024xf32, #tpu.memory_space<vmem>>, vector<8x256xf32>
    %c24_127 = arith.constant 24 : index
    %c0_128 = arith.constant 0 : index
    %155 = vector.load %arg10[%c24_127, %c0_128] : memref<128x512xf32, #tpu.memory_space<vmem>>, vector<8x256xf32>
    tpu.vector_store %arg10[%c24_127, %c0_128], %154 {strides = array<i32>} : memref<128x512xf32, #tpu.memory_space<vmem>>, vector<8x256xf32>,
    %c0_129 = arith.constant 0 : index
    %c128_130 = arith.constant 128 : index
    %156 = vector.load %arg9[%c0_129, %c128_130] : memref<8x1024xf32, #tpu.memory_space<vmem>>, vector<8x256xf32>
    %c32_131 = arith.constant 32 : index
    %c0_132 = arith.constant 0 : index
    %157 = vector.load %arg10[%c32_131, %c0_132] : memref<128x512xf32, #tpu.memory_space<vmem>>, vector<8x256xf32>
    tpu.vector_store %arg10[%c32_131, %c0_132], %156 {strides = array<i32>} : memref<128x512xf32, #tpu.memory_space<vmem>>, vector<8x256xf32>,
    %c0_133 = arith.constant 0 : index
    %c129 = arith.constant 129 : index
    %158 = vector.load %arg9[%c0_133, %c129] : memref<8x1024xf32, #tpu.memory_space<vmem>>, vector<8x256xf32>
    %c40_134 = arith.constant 40 : index
    %c0_135 = arith.constant 0 : index
    %159 = vector.load %arg10[%c40_134, %c0_135] : memref<128x512xf32, #tpu.memory_space<vmem>>, vector<8x256xf32>
    tpu.vector_store %arg10[%c40_134, %c0_135], %158 {strides = array<i32>} : memref<128x512xf32, #tpu.memory_space<vmem>>, vector<8x256xf32>,
    %c0_136 = arith.constant 0 : index
    %c130 = arith.constant 130 : index
    %160 = vector.load %arg9[%c0_136, %c130] : memref<8x1024xf32, #tpu.memory_space<vmem>>, vector<8x256xf32>
    %c48_137 = arith.constant 48 : index
    %c0_138 = arith.constant 0 : index
    %161 = vector.load %arg10[%c48_137, %c0_138] : memref<128x512xf32, #tpu.memory_space<vmem>>, vector<8x256xf32>
    tpu.vector_store %arg10[%c48_137, %c0_138], %160 {strides = array<i32>} : memref<128x512xf32, #tpu.memory_space<vmem>>, vector<8x256xf32>,
    %c0_139 = arith.constant 0 : index
    %c131 = arith.constant 131 : index
    %162 = vector.load %arg9[%c0_139, %c131] : memref<8x1024xf32, #tpu.memory_space<vmem>>, vector<8x256xf32>
    %c56_140 = arith.constant 56 : index
    %c0_141 = arith.constant 0 : index
    %163 = vector.load %arg10[%c56_140, %c0_141] : memref<128x512xf32, #tpu.memory_space<vmem>>, vector<8x256xf32>
    tpu.vector_store %arg10[%c56_140, %c0_141], %162 {strides = array<i32>} : memref<128x512xf32, #tpu.memory_space<vmem>>, vector<8x256xf32>,
    %c0_142 = arith.constant 0 : index
    %c112 = arith.constant 112 : index
    %164 = vector.load %arg9[%c0_142, %c112] : memref<8x1024xf32, #tpu.memory_space<vmem>>, vector<8x256xf32>
    %c64_143 = arith.constant 64 : index
    %c0_144 = arith.constant 0 : index
    %165 = vector.load %arg10[%c64_143, %c0_144] : memref<128x512xf32, #tpu.memory_space<vmem>>, vector<8x256xf32>
    tpu.vector_store %arg10[%c64_143, %c0_144], %164 {strides = array<i32>} : memref<128x512xf32, #tpu.memory_space<vmem>>, vector<8x256xf32>,
    %c0_145 = arith.constant 0 : index
    %c113 = arith.constant 113 : index
    %166 = vector.load %arg9[%c0_145, %c113] : memref<8x1024xf32, #tpu.memory_space<vmem>>, vector<8x256xf32>
    %c72 = arith.constant 72 : index
    %c0_146 = arith.constant 0 : index
    %167 = vector.load %arg10[%c72, %c0_146] : memref<128x512xf32, #tpu.memory_space<vmem>>, vector<8x256xf32>
    tpu.vector_store %arg10[%c72, %c0_146], %166 {strides = array<i32>} : memref<128x512xf32, #tpu.memory_space<vmem>>, vector<8x256xf32>,
    %c0_147 = arith.constant 0 : index
    %c114 = arith.constant 114 : index
    %168 = vector.load %arg9[%c0_147, %c114] : memref<8x1024xf32, #tpu.memory_space<vmem>>, vector<8x256xf32>
    %c80 = arith.constant 80 : index
    %c0_148 = arith.constant 0 : index
    %169 = vector.load %arg10[%c80, %c0_148] : memref<128x512xf32, #tpu.memory_space<vmem>>, vector<8x256xf32>
    tpu.vector_store %arg10[%c80, %c0_148], %168 {strides = array<i32>} : memref<128x512xf32, #tpu.memory_space<vmem>>, vector<8x256xf32>,
    %c0_149 = arith.constant 0 : index
    %c115 = arith.constant 115 : index
    %170 = vector.load %arg9[%c0_149, %c115] : memref<8x1024xf32, #tpu.memory_space<vmem>>, vector<8x256xf32>
    %c88 = arith.constant 88 : index
    %c0_150 = arith.constant 0 : index
    %171 = vector.load %arg10[%c88, %c0_150] : memref<128x512xf32, #tpu.memory_space<vmem>>, vector<8x256xf32>
    tpu.vector_store %arg10[%c88, %c0_150], %170 {strides = array<i32>} : memref<128x512xf32, #tpu.memory_space<vmem>>, vector<8x256xf32>,
    %c0_151 = arith.constant 0 : index
    %c144 = arith.constant 144 : index
    %172 = vector.load %arg9[%c0_151, %c144] : memref<8x1024xf32, #tpu.memory_space<vmem>>, vector<8x256xf32>
    %c96_152 = arith.constant 96 : index
    %c0_153 = arith.constant 0 : index
    %173 = vector.load %arg10[%c96_152, %c0_153] : memref<128x512xf32, #tpu.memory_space<vmem>>, vector<8x256xf32>
    tpu.vector_store %arg10[%c96_152, %c0_153], %172 {strides = array<i32>} : memref<128x512xf32, #tpu.memory_space<vmem>>, vector<8x256xf32>,
    %c0_154 = arith.constant 0 : index
    %c145 = arith.constant 145 : index
    %174 = vector.load %arg9[%c0_154, %c145] : memref<8x1024xf32, #tpu.memory_space<vmem>>, vector<8x256xf32>
    %c104 = arith.constant 104 : index
    %c0_155 = arith.constant 0 : index
    %175 = vector.load %arg10[%c104, %c0_155] : memref<128x512xf32, #tpu.memory_space<vmem>>, vector<8x256xf32>
    tpu.vector_store %arg10[%c104, %c0_155], %174 {strides = array<i32>} : memref<128x512xf32, #tpu.memory_space<vmem>>, vector<8x256xf32>,
    %c0_156 = arith.constant 0 : index
    %c146 = arith.constant 146 : index
    %176 = vector.load %arg9[%c0_156, %c146] : memref<8x1024xf32, #tpu.memory_space<vmem>>, vector<8x256xf32>
    %c112_157 = arith.constant 112 : index
    %c0_158 = arith.constant 0 : index
    %177 = vector.load %arg10[%c112_157, %c0_158] : memref<128x512xf32, #tpu.memory_space<vmem>>, vector<8x256xf32>
    tpu.vector_store %arg10[%c112_157, %c0_158], %176 {strides = array<i32>} : memref<128x512xf32, #tpu.memory_space<vmem>>, vector<8x256xf32>,
    %c0_159 = arith.constant 0 : index
    %c147 = arith.constant 147 : index
    %178 = vector.load %arg9[%c0_159, %c147] : memref<8x1024xf32, #tpu.memory_space<vmem>>, vector<8x256xf32>
    %c120 = arith.constant 120 : index
    %c0_160 = arith.constant 0 : index
    %179 = vector.load %arg10[%c120, %c0_160] : memref<128x512xf32, #tpu.memory_space<vmem>>, vector<8x256xf32>
    tpu.vector_store %arg10[%c120, %c0_160], %178 {strides = array<i32>} : memref<128x512xf32, #tpu.memory_space<vmem>>, vector<8x256xf32>,
    %c0_161 = arith.constant 0 : index
    %c608 = arith.constant 608 : index
    %180 = vector.load %arg9[%c0_161, %c608] : memref<8x1024xf32, #tpu.memory_space<vmem>>, vector<8x256xf32>
    %c0_162 = arith.constant 0 : index
    %c256_163 = arith.constant 256 : index
    %181 = vector.load %arg10[%c0_162, %c256_163] : memref<128x512xf32, #tpu.memory_space<vmem>>, vector<8x256xf32>
    tpu.vector_store %arg10[%c0_162, %c256_163], %180 {strides = array<i32>} : memref<128x512xf32, #tpu.memory_space<vmem>>, vector<8x256xf32>,
    %c0_164 = arith.constant 0 : index
    %c609 = arith.constant 609 : index
    %182 = vector.load %arg9[%c0_164, %c609] : memref<8x1024xf32, #tpu.memory_space<vmem>>, vector<8x256xf32>
    %c8_165 = arith.constant 8 : index
    %c256_166 = arith.constant 256 : index
    %183 = vector.load %arg10[%c8_165, %c256_166] : memref<128x512xf32, #tpu.memory_space<vmem>>, vector<8x256xf32>
    tpu.vector_store %arg10[%c8_165, %c256_166], %182 {strides = array<i32>} : memref<128x512xf32, #tpu.memory_space<vmem>>, vector<8x256xf32>,
    %c0_167 = arith.constant 0 : index
    %c610 = arith.constant 610 : index
    %184 = vector.load %arg9[%c0_167, %c610] : memref<8x1024xf32, #tpu.memory_space<vmem>>, vector<8x256xf32>
    %c16_168 = arith.constant 16 : index
    %c256_169 = arith.constant 256 : index
    %185 = vector.load %arg10[%c16_168, %c256_169] : memref<128x512xf32, #tpu.memory_space<vmem>>, vector<8x256xf32>
    tpu.vector_store %arg10[%c16_168, %c256_169], %184 {strides = array<i32>} : memref<128x512xf32, #tpu.memory_space<vmem>>, vector<8x256xf32>,
    %c0_170 = arith.constant 0 : index
    %c611 = arith.constant 611 : index
    %186 = vector.load %arg9[%c0_170, %c611] : memref<8x1024xf32, #tpu.memory_space<vmem>>, vector<8x256xf32>
    %c24_171 = arith.constant 24 : index
    %c256_172 = arith.constant 256 : index
    %187 = vector.load %arg10[%c24_171, %c256_172] : memref<128x512xf32, #tpu.memory_space<vmem>>, vector<8x256xf32>
    tpu.vector_store %arg10[%c24_171, %c256_172], %186 {strides = array<i32>} : memref<128x512xf32, #tpu.memory_space<vmem>>, vector<8x256xf32>,
    %c0_173 = arith.constant 0 : index
    %c640_174 = arith.constant 640 : index
    %188 = vector.load %arg9[%c0_173, %c640_174] : memref<8x1024xf32, #tpu.memory_space<vmem>>, vector<8x256xf32>
    %c32_175 = arith.constant 32 : index
    %c256_176 = arith.constant 256 : index
    %189 = vector.load %arg10[%c32_175, %c256_176] : memref<128x512xf32, #tpu.memory_space<vmem>>, vector<8x256xf32>
    tpu.vector_store %arg10[%c32_175, %c256_176], %188 {strides = array<i32>} : memref<128x512xf32, #tpu.memory_space<vmem>>, vector<8x256xf32>,
    %c0_177 = arith.constant 0 : index
    %c641 = arith.constant 641 : index
    %190 = vector.load %arg9[%c0_177, %c641] : memref<8x1024xf32, #tpu.memory_space<vmem>>, vector<8x256xf32>
    %c40_178 = arith.constant 40 : index
    %c256_179 = arith.constant 256 : index
    %191 = vector.load %arg10[%c40_178, %c256_179] : memref<128x512xf32, #tpu.memory_space<vmem>>, vector<8x256xf32>
    tpu.vector_store %arg10[%c40_178, %c256_179], %190 {strides = array<i32>} : memref<128x512xf32, #tpu.memory_space<vmem>>, vector<8x256xf32>,
    %c0_180 = arith.constant 0 : index
    %c642 = arith.constant 642 : index
    %192 = vector.load %arg9[%c0_180, %c642] : memref<8x1024xf32, #tpu.memory_space<vmem>>, vector<8x256xf32>
    %c48_181 = arith.constant 48 : index
    %c256_182 = arith.constant 256 : index
    %193 = vector.load %arg10[%c48_181, %c256_182] : memref<128x512xf32, #tpu.memory_space<vmem>>, vector<8x256xf32>
    tpu.vector_store %arg10[%c48_181, %c256_182], %192 {strides = array<i32>} : memref<128x512xf32, #tpu.memory_space<vmem>>, vector<8x256xf32>,
    %c0_183 = arith.constant 0 : index
    %c643 = arith.constant 643 : index
    %194 = vector.load %arg9[%c0_183, %c643] : memref<8x1024xf32, #tpu.memory_space<vmem>>, vector<8x256xf32>
    %c56_184 = arith.constant 56 : index
    %c256_185 = arith.constant 256 : index
    %195 = vector.load %arg10[%c56_184, %c256_185] : memref<128x512xf32, #tpu.memory_space<vmem>>, vector<8x256xf32>
    tpu.vector_store %arg10[%c56_184, %c256_185], %194 {strides = array<i32>} : memref<128x512xf32, #tpu.memory_space<vmem>>, vector<8x256xf32>,
    %c0_186 = arith.constant 0 : index
    %c624 = arith.constant 624 : index
    %196 = vector.load %arg9[%c0_186, %c624] : memref<8x1024xf32, #tpu.memory_space<vmem>>, vector<8x256xf32>
    %c64_187 = arith.constant 64 : index
    %c256_188 = arith.constant 256 : index
    %197 = vector.load %arg10[%c64_187, %c256_188] : memref<128x512xf32, #tpu.memory_space<vmem>>, vector<8x256xf32>
    tpu.vector_store %arg10[%c64_187, %c256_188], %196 {strides = array<i32>} : memref<128x512xf32, #tpu.memory_space<vmem>>, vector<8x256xf32>,
    %c0_189 = arith.constant 0 : index
    %c625 = arith.constant 625 : index
    %198 = vector.load %arg9[%c0_189, %c625] : memref<8x1024xf32, #tpu.memory_space<vmem>>, vector<8x256xf32>
    %c72_190 = arith.constant 72 : index
    %c256_191 = arith.constant 256 : index
    %199 = vector.load %arg10[%c72_190, %c256_191] : memref<128x512xf32, #tpu.memory_space<vmem>>, vector<8x256xf32>
    tpu.vector_store %arg10[%c72_190, %c256_191], %198 {strides = array<i32>} : memref<128x512xf32, #tpu.memory_space<vmem>>, vector<8x256xf32>,
    %c0_192 = arith.constant 0 : index
    %c626 = arith.constant 626 : index
    %200 = vector.load %arg9[%c0_192, %c626] : memref<8x1024xf32, #tpu.memory_space<vmem>>, vector<8x256xf32>
    %c80_193 = arith.constant 80 : index
    %c256_194 = arith.constant 256 : index
    %201 = vector.load %arg10[%c80_193, %c256_194] : memref<128x512xf32, #tpu.memory_space<vmem>>, vector<8x256xf32>
    tpu.vector_store %arg10[%c80_193, %c256_194], %200 {strides = array<i32>} : memref<128x512xf32, #tpu.memory_space<vmem>>, vector<8x256xf32>,
    %c0_195 = arith.constant 0 : index
    %c627 = arith.constant 627 : index
    %202 = vector.load %arg9[%c0_195, %c627] : memref<8x1024xf32, #tpu.memory_space<vmem>>, vector<8x256xf32>
    %c88_196 = arith.constant 88 : index
    %c256_197 = arith.constant 256 : index
    %203 = vector.load %arg10[%c88_196, %c256_197] : memref<128x512xf32, #tpu.memory_space<vmem>>, vector<8x256xf32>
    tpu.vector_store %arg10[%c88_196, %c256_197], %202 {strides = array<i32>} : memref<128x512xf32, #tpu.memory_space<vmem>>, vector<8x256xf32>,
    %c0_198 = arith.constant 0 : index
    %c656 = arith.constant 656 : index
    %204 = vector.load %arg9[%c0_198, %c656] : memref<8x1024xf32, #tpu.memory_space<vmem>>, vector<8x256xf32>
    %c96_199 = arith.constant 96 : index
    %c256_200 = arith.constant 256 : index
    %205 = vector.load %arg10[%c96_199, %c256_200] : memref<128x512xf32, #tpu.memory_space<vmem>>, vector<8x256xf32>
    tpu.vector_store %arg10[%c96_199, %c256_200], %204 {strides = array<i32>} : memref<128x512xf32, #tpu.memory_space<vmem>>, vector<8x256xf32>,
    %c0_201 = arith.constant 0 : index
    %c657 = arith.constant 657 : index
    %206 = vector.load %arg9[%c0_201, %c657] : memref<8x1024xf32, #tpu.memory_space<vmem>>, vector<8x256xf32>
    %c104_202 = arith.constant 104 : index
    %c256_203 = arith.constant 256 : index
    %207 = vector.load %arg10[%c104_202, %c256_203] : memref<128x512xf32, #tpu.memory_space<vmem>>, vector<8x256xf32>
    tpu.vector_store %arg10[%c104_202, %c256_203], %206 {strides = array<i32>} : memref<128x512xf32, #tpu.memory_space<vmem>>, vector<8x256xf32>,
    %c0_204 = arith.constant 0 : index
    %c658 = arith.constant 658 : index
    %208 = vector.load %arg9[%c0_204, %c658] : memref<8x1024xf32, #tpu.memory_space<vmem>>, vector<8x256xf32>
    %c112_205 = arith.constant 112 : index
    %c256_206 = arith.constant 256 : index
    %209 = vector.load %arg10[%c112_205, %c256_206] : memref<128x512xf32, #tpu.memory_space<vmem>>, vector<8x256xf32>
    tpu.vector_store %arg10[%c112_205, %c256_206], %208 {strides = array<i32>} : memref<128x512xf32, #tpu.memory_space<vmem>>, vector<8x256xf32>,
    %c0_207 = arith.constant 0 : index
    %c659 = arith.constant 659 : index
    %210 = vector.load %arg9[%c0_207, %c659] : memref<8x1024xf32, #tpu.memory_space<vmem>>, vector<8x256xf32>
    %c120_208 = arith.constant 120 : index
    %c256_209 = arith.constant 256 : index
    %211 = vector.load %arg10[%c120_208, %c256_209] : memref<128x512xf32, #tpu.memory_space<vmem>>, vector<8x256xf32>
    tpu.vector_store %arg10[%c120_208, %c256_209], %210 {strides = array<i32>} : memref<128x512xf32, #tpu.memory_space<vmem>>, vector<8x256xf32>,
    %c0_210 = arith.constant 0 : index
    %c0_211 = arith.constant 0 : index
    %212 = vector.load %arg3[%c0_210, %c0_211] : memref<8x128xf32, #tpu.memory_space<vmem>>, vector<8x128xf32>
    %c0_212 = arith.constant 0 : index
    %c0_213 = arith.constant 0 : index
    %213 = vector.load %arg10[%c0_212, %c0_213] : memref<128x512xf32, #tpu.memory_space<vmem>>, vector<128x512xf32>
    %cst_214 = arith.constant dense<0.000000e+00> : vector<8x512xf32>
    %214 = tpu.matmul %212, %213, %cst_214 {dimension_numbers = #tpu.dot_dimension_numbers<[1], [0], [0], [1], [0, 0, 1, 1], [], []>} : vector<8x128xf32>, vector<128x512xf32>, vector<8x512xf32> -> vector<8x512xf32>
    %c0_215 = arith.constant 0 : index
    %c0_216 = arith.constant 0 : index
    %215 = vector.load %arg5[%c0_215, %c0_216] : memref<1x512xf32, #tpu.memory_space<vmem>>, vector<1x512xf32>
    %cst_217 = arith.constant 5.000000e-01 : f32
    %216 = vector.broadcast %cst_217 : f32 to vector<1x512xf32>
    %217 = arith.cmpf ogt, %215, %216 : vector<1x512xf32>
    %218 = vector.extract_strided_slice %214 {offsets = [0, 0], sizes = [4, 512], strides = [1, 1]} : vector<8x512xf32> to vector<4x512xf32>
    %219 = vector.extract_strided_slice %214 {offsets = [4, 0], sizes = [4, 512], strides = [1, 1]} : vector<8x512xf32> to vector<4x512xf32>
    %220 = vector.shape_cast %217 : vector<1x512xi1> to vector<1x512xi1>
    %221 = vector.broadcast %220 : vector<1x512xi1> to vector<4x512xi1>
    %222 = arith.select %221, %218, %219 : vector<4x512xi1>, vector<4x512xf32>
    %c0_218 = arith.constant 0 : index
    %c0_219 = arith.constant 0 : index
    %c0_220 = arith.constant 0 : index
    %223 = vector.load %arg6[%c0_218, %c0_219, %c0_220] : memref<1x4x512xf32, #tpu.memory_space<vmem>>, vector<1x4x512xf32>
    %224 = vector.shape_cast %223 : vector<1x4x512xf32> to vector<4x512xf32>
    %225 = vector.shape_cast %222 : vector<4x512xf32> to vector<1x4x512xf32>
    tpu.vector_store %arg6[%c0_218, %c0_219, %c0_220], %225 {strides = array<i32>} : memref<1x4x512xf32, #tpu.memory_space<vmem>>, vector<1x4x512xf32>,
    %cst_221 = arith.constant dense<0.000000e+00> : vector<4xf32>
    %226 = vector.multi_reduction <add>, %222, %cst_221 [1] : vector<4x512xf32> to vector<4xf32>
    %227 = vector.shape_cast %226 : vector<4xf32> to vector<4x1xf32>
    %228 = arith.mulf %222, %222 : vector<4x512xf32>
    %cst_222 = arith.constant dense<0.000000e+00> : vector<4xf32>
    %229 = vector.multi_reduction <add>, %228, %cst_222 [1] : vector<4x512xf32> to vector<4xf32>
    %230 = vector.shape_cast %229 : vector<4xf32> to vector<4x1xf32>
    %231 = tpu.concatenate %227, %230 in 1 : vector<4x1xf32>, vector<4x1xf32> -> vector<4x2xf32>
    %c0_223 = arith.constant 0 : index
    %c0_224 = arith.constant 0 : index
    %c0_225 = arith.constant 0 : index
    %232 = vector.load %arg7[%c0_223, %c0_224, %c0_225] : memref<1x4x2xf32, #tpu.memory_space<vmem>>, vector<1x4x2xf32>
    %233 = vector.shape_cast %232 : vector<1x4x2xf32> to vector<4x2xf32>
    %234 = vector.shape_cast %231 : vector<4x2xf32> to vector<1x4x2xf32>
    tpu.vector_store %arg7[%c0_223, %c0_224, %c0_225], %234 {strides = array<i32>} : memref<1x4x2xf32, #tpu.memory_space<vmem>>, vector<1x4x2xf32>,
    return
  }
  func.func @transform_0(%arg0: i32) -> (i32, i32, i32) {
    %c0_i32 = arith.constant 0 : i32
    %c0_i32_0 = arith.constant 0 : i32
    %c0_i32_1 = arith.constant 0 : i32
    return %arg0, %c0_i32, %c0_i32_0 : i32, i32, i32
  }
  func.func @transform_1(%arg0: i32) -> (i32, i32) {
    %c0_i32 = arith.constant 0 : i32
    %c0_i32_0 = arith.constant 0 : i32
    %c0_i32_1 = arith.constant 0 : i32
    return %c0_i32, %c0_i32_0 : i32, i32
  }
  func.func @transform_2(%arg0: i32) -> (i32, i32) {
    %c0_i32 = arith.constant 0 : i32
    %c0_i32_0 = arith.constant 0 : i32
    %c0_i32_1 = arith.constant 0 : i32
    return %c0_i32, %c0_i32_0 : i32, i32
  }
  func.func @transform_3(%arg0: i32) -> (i32, i32) {
    %c0_i32 = arith.constant 0 : i32
    %c0_i32_0 = arith.constant 0 : i32
    %c0_i32_1 = arith.constant 0 : i32
    return %c0_i32, %c0_i32_0 : i32, i32
  }
  func.func @transform_4(%arg0: i32) -> (i32, i32) {
    %c0_i32 = arith.constant 0 : i32
    %c0_i32_0 = arith.constant 0 : i32
    %c0_i32_1 = arith.constant 0 : i32
    return %c0_i32, %c0_i32_0 : i32, i32
  }
  func.func @transform_5(%arg0: i32) -> (i32, i32, i32) {
    %c0_i32 = arith.constant 0 : i32
    %c0_i32_0 = arith.constant 0 : i32
    %c0_i32_1 = arith.constant 0 : i32
    return %arg0, %c0_i32, %c0_i32_0 : i32, i32, i32
  }
  func.func @transform_6(%arg0: i32) -> (i32, i32, i32) {
    %c0_i32 = arith.constant 0 : i32
    %c0_i32_0 = arith.constant 0 : i32
    %c0_i32_1 = arith.constant 0 : i32
    return %arg0, %c0_i32, %c0_i32_0 : i32, i32, i32
  }
}

module attributes {stable_mosaic.version = 11 : i64} {
  func.func @bn_concat_kernel(%arg0: i32, %arg1: memref<2x4x256xf32, #tpu.memory_space<vmem>>, %arg2: memref<1x4x512xf32, #tpu.memory_space<vmem>>, %arg3: memref<4x1xf32, #tpu.memory_space<vmem>>, %arg4: memref<4x1xf32, #tpu.memory_space<vmem>>, %arg5: memref<2x8x256xf32, #tpu.memory_space<vmem>>) attributes {dimension_semantics = [#tpu.dimension_semantics<parallel>], iteration_bounds = array<i64: 1>, scalar_prefetch = 0 : i64, scratch_operands = 0 : i64, tpu.core_type = #tpu.core_type<tc>, window_params = [{transform_indices = @transform_0, window_bounds = array<i64: 2, 4, 256>}, {transform_indices = @transform_1, window_bounds = array<i64: 1, 4, 512>}, {pipeline_mode = #tpu.pipeline_mode<synchronous>, transform_indices = @transform_2, window_bounds = array<i64: 4, 1>}, {pipeline_mode = #tpu.pipeline_mode<synchronous>, transform_indices = @transform_3, window_bounds = array<i64: 4, 1>}, {transform_indices = @transform_4, window_bounds = array<i64: 2, 8, 256>}]} {
    %c0 = arith.constant 0 : index
    %c0_0 = arith.constant 0 : index
    %0 = vector.load %arg3[%c0, %c0_0] : memref<4x1xf32, #tpu.memory_space<vmem>>, vector<4x1xf32>
    %c0_1 = arith.constant 0 : index
    %c0_2 = arith.constant 0 : index
    %1 = vector.load %arg4[%c0_1, %c0_2] : memref<4x1xf32, #tpu.memory_space<vmem>>, vector<4x1xf32>
    %c0_3 = arith.constant 0 : index
    %c0_4 = arith.constant 0 : index
    %c0_5 = arith.constant 0 : index
    %2 = vector.load %arg2[%c0_3, %c0_4, %c0_5] : memref<1x4x512xf32, #tpu.memory_space<vmem>>, vector<1x4x256xf32>
    %3 = vector.shape_cast %2 : vector<1x4x256xf32> to vector<4x256xf32>
    %4 = vector.broadcast %0 : vector<4x1xf32> to vector<4x256xf32>
    %5 = arith.mulf %3, %4 : vector<4x256xf32>
    %6 = vector.broadcast %1 : vector<4x1xf32> to vector<4x256xf32>
    %7 = arith.addf %5, %6 : vector<4x256xf32>
    %c0_6 = arith.constant 0 : index
    %c0_7 = arith.constant 0 : index
    %c0_8 = arith.constant 0 : index
    %8 = vector.load %arg1[%c0_6, %c0_7, %c0_8] : memref<2x4x256xf32, #tpu.memory_space<vmem>>, vector<1x4x256xf32>
    %9 = vector.shape_cast %8 : vector<1x4x256xf32> to vector<4x256xf32>
    %10 = tpu.concatenate %9, %7 in 0 : vector<4x256xf32>, vector<4x256xf32> -> vector<8x256xf32>
    %c0_9 = arith.constant 0 : index
    %c0_10 = arith.constant 0 : index
    %c0_11 = arith.constant 0 : index
    %11 = vector.load %arg5[%c0_9, %c0_10, %c0_11] : memref<2x8x256xf32, #tpu.memory_space<vmem>>, vector<1x8x256xf32>
    %12 = vector.shape_cast %11 : vector<1x8x256xf32> to vector<8x256xf32>
    %13 = vector.shape_cast %10 : vector<8x256xf32> to vector<1x8x256xf32>
    tpu.vector_store %arg5[%c0_9, %c0_10, %c0_11], %13 {strides = array<i32>} : memref<2x8x256xf32, #tpu.memory_space<vmem>>, vector<1x8x256xf32>,
    %c0_12 = arith.constant 0 : index
    %c0_13 = arith.constant 0 : index
    %c256 = arith.constant 256 : index
    %14 = vector.load %arg2[%c0_12, %c0_13, %c256] : memref<1x4x512xf32, #tpu.memory_space<vmem>>, vector<1x4x256xf32>
    %15 = vector.shape_cast %14 : vector<1x4x256xf32> to vector<4x256xf32>
    %16 = vector.broadcast %0 : vector<4x1xf32> to vector<4x256xf32>
    %17 = arith.mulf %15, %16 : vector<4x256xf32>
    %18 = vector.broadcast %1 : vector<4x1xf32> to vector<4x256xf32>
    %19 = arith.addf %17, %18 : vector<4x256xf32>
    %c1 = arith.constant 1 : index
    %c0_14 = arith.constant 0 : index
    %c0_15 = arith.constant 0 : index
    %20 = vector.load %arg1[%c1, %c0_14, %c0_15] : memref<2x4x256xf32, #tpu.memory_space<vmem>>, vector<1x4x256xf32>
    %21 = vector.shape_cast %20 : vector<1x4x256xf32> to vector<4x256xf32>
    %22 = tpu.concatenate %21, %19 in 0 : vector<4x256xf32>, vector<4x256xf32> -> vector<8x256xf32>
    %c1_16 = arith.constant 1 : index
    %c0_17 = arith.constant 0 : index
    %c0_18 = arith.constant 0 : index
    %23 = vector.load %arg5[%c1_16, %c0_17, %c0_18] : memref<2x8x256xf32, #tpu.memory_space<vmem>>, vector<1x8x256xf32>
    %24 = vector.shape_cast %23 : vector<1x8x256xf32> to vector<8x256xf32>
    %25 = vector.shape_cast %22 : vector<8x256xf32> to vector<1x8x256xf32>
    tpu.vector_store %arg5[%c1_16, %c0_17, %c0_18], %25 {strides = array<i32>} : memref<2x8x256xf32, #tpu.memory_space<vmem>>, vector<1x8x256xf32>,
    return
  }
  func.func @transform_0(%arg0: i32) -> (i32, i32, i32) {
    %c0_i32 = arith.constant 0 : i32
    %c0_i32_0 = arith.constant 0 : i32
    %c0_i32_1 = arith.constant 0 : i32
    return %arg0, %c0_i32, %c0_i32_0 : i32, i32, i32
  }
  func.func @transform_1(%arg0: i32) -> (i32, i32, i32) {
    %c0_i32 = arith.constant 0 : i32
    %c0_i32_0 = arith.constant 0 : i32
    %c0_i32_1 = arith.constant 0 : i32
    return %arg0, %c0_i32, %c0_i32_0 : i32, i32, i32
  }
  func.func @transform_2(%arg0: i32) -> (i32, i32) {
    %c0_i32 = arith.constant 0 : i32
    %c0_i32_0 = arith.constant 0 : i32
    %c0_i32_1 = arith.constant 0 : i32
    return %c0_i32, %c0_i32_0 : i32, i32
  }
  func.func @transform_3(%arg0: i32) -> (i32, i32) {
    %c0_i32 = arith.constant 0 : i32
    %c0_i32_0 = arith.constant 0 : i32
    %c0_i32_1 = arith.constant 0 : i32
    return %c0_i32, %c0_i32_0 : i32, i32
  }
  func.func @transform_4(%arg0: i32) -> (i32, i32, i32) {
    %c0_i32 = arith.constant 0 : i32
    %c0_i32_0 = arith.constant 0 : i32
    %c0_i32_1 = arith.constant 0 : i32
    return %arg0, %c0_i32, %c0_i32_0 : i32, i32, i32
  }
}

</mosaic_0001>

<bundles_post_ra>
// kernel: unet_innermost_forward.3
= control target key start
LH: loop header
LB: loop body
LE: loop exit
PB: predicated region body
PF: predicated region fallthrough
CT: control target
= control target key end

     0   :  { %v86_v0 = vmov 0   ;;  %v87_v3 = vmov 839922192   ;;  %v27_v5 = vlaneseq  ;;  %vm53_vm0 = vcmask 1043456   ;;  %s143_s2 = inlined_call_operand.vmem [shape: f32[4,1], index: 2, kind: input, shape index: {}]   ;;  %s144_s3 = inlined_call_operand.vmem [shape: f32[4,1], index: 3, kind: input, shape index: {}]   ;;  %s145_s0 = inlined_call_operand.vmem [shape: f32[2,4,256], index: 0, kind: input, shape index: {}]   ;;  %s146_s1 = inlined_call_operand.vmem [shape: f32[1,4,512], index: 1, kind: input, shape index: {}]   ;;  %s147_s4 = inlined_call_operand.vmem [shape: f32[2,8,256], index: 4, kind: output, shape index: {}]  }
   0x1   :  { %83 = vset.pattern.permute.xlu0 %v86_v0  ;;  %v17_v1 = vld [vmem:[%s143_s2] sm:$0xf]  ;;  %v25_v4 = vunpack.c.l.s4 %v87_v3  ;;  %v58_v13 = vld [vmem:[%s146_s1 + $0x8] sm:$0xff] }
   0x2   :  { %22 = vperm.xlu0 %83, %v17_v1   ;;  %v18_v2 = vld [vmem:[%s144_s3] sm:$0xf]  ;;  %v28_v7 = vshrl.u32 %v27_v5, 7  ;;  %v78_v14 = vld [vmem:[%s145_s0 + $0x8] sm:$0xff] }
   0x3   :  { %v26_v6 = vunpack.c.0.s8 %v25_v4  ;;  %v46_v11 = vld [vmem:[%s145_s0] sm:$0xff]  ;;  %v64_v20 = vcombine.high %v78_v14, %v78_v14 }
   0x4   :  { %v19_v12 = vld [vmem:[%s146_s1] sm:$0xff]  ;;  %v48_v16 = vcombine.high %v46_v11, %v46_v11 }
   0x5   :  { %v29_v8 = vsub.s32 %v26_v6, %v28_v7 }
   0x6   :  { %35 = vperm.xlu0 %83, %v18_v2  }
  0x7d   :  { %v23_v9 = vpop.permute.xlu0 %22 }
  0x7e   :  { %v30_v10 = vrot.slane %v23_v9, %v29_v8 }
  0x80   :  { %v32_v17 = vmul.f32 %v30_v10, %v19_v12  ;;  %v59_v18 = vmul.f32 %v58_v13, %v30_v10 }
  0x81   :  { %v36_v15 = vpop.permute.xlu0 %35 }
  0x82   :  { %v43_v19 = vrot.slane %v36_v15, %v29_v8 }
  0x84   :  { %v45_v21 = vadd.f32 %v43_v19, %v32_v17  ;;  %v60_v22 = vadd.f32 %v59_v18, %v43_v19 }
  0x86   :  { %v51_v23 = vcombine.low %v45_v21, %v45_v21  ;;  %v55_v24 = vsel %vm53_vm0, %v48_v16, %v45_v21  ;;  %v67_v25 = vcombine.low %v60_v22, %v60_v22  ;;  %v70_v26 = vsel %vm53_vm0, %v64_v20, %v60_v22 }
  0x87   :  { %57 = vst [vmem:[%s147_s4 + $0x8] sm:$0xff] %v55_v24  ;;  %80 = vst [vmem:[%s147_s4 + $0x18] sm:$0xff] %v70_v26 }
  0x88   :  { %v54_v27 = vsel %vm53_vm0, %v46_v11, %v51_v23  ;;  %v69_v28 = vsel %vm53_vm0, %v78_v14, %v67_v25 }
  0x89   :  { %56 = vst [vmem:[%s147_s4] sm:$0xff] %v54_v27  ;;  %79 = vst [vmem:[%s147_s4 + $0x10] sm:$0xff] %v69_v28 }

// kernel: unet_innermost_forward.2
= control target key start
LH: loop header
LB: loop body
LE: loop exit
PB: predicated region body
PF: predicated region fallthrough
CT: control target
= control target key end

     0   :  { %s1646_s27 = smov 64   ;;  %s1647_s28 = smov 66   ;;  %v1650_v36 = vmov 0.0   ;;  %vm127_vm12 = vcmask 523264   ;;  %vm99_vm13 = vcmask 539648   ;;  %vm71_vm14 = vcmask 785408   ;;  %s2257_s0 = inlined_call_operand.vmem [shape: f32[2,16,384], index: 0, kind: input, shape index: {}]   ;;  %s2258_s1 = inlined_call_operand.vmem [shape: f32[8,64], index: 1, kind: input, shape index: {}]   ;;  %s2259_s3 = inlined_call_operand.vmem [shape: f32[1,512], index: 3, kind: input, shape index: {}]   ;;  %s2260_s2 = inlined_call_operand.vmem [shape: f32[8,128], index: 2, kind: input, shape index: {}]   ;;  %s2261_s4 = inlined_call_operand.vmem [shape: f32[1,512], index: 4, kind: input, shape index: {}]   ;;  %s2262_s5 = inlined_call_operand.vmem [shape: f32[1,4,512], index: 5, kind: output, shape index: {0}]   ;;  %s2263_s6 = inlined_call_operand.vmem [shape: f32[1,4,2], index: 6, kind: output, shape index: {1}]  }
   0x1   :  { %v216_v0 = vld [vmem:[%s2257_s0 + $0x20] sm:$0xff]  ;;  %v215_v1 = vld [vmem:[%s2257_s0 + $0x18] sm:$0xff]  ;;  %v217_v2 = vld [vmem:[%s2257_s0 + $0x28] sm:$0xff]  ;;  %s1648_s11 = smov 96   ;;  %s1649_s12 = smov 98   ;;  %559 = vmatprep.mubr.f32.mxu0 %v1650_v36  ;;  %630 = vmatprep.mubr.f32.mxu1 %v1650_v36  ;;  %vm43_vm15 = vcmask 801792  }
   0x2   :  { %vm219_vm0 = vcmp.ge.f32.partialorder %v216_v0, 0.0  ;;  %v222_v3 = vmul.f32 0.2, %v216_v0  ;;  %vm218_vm1 = vcmp.ge.f32.partialorder %v215_v1, 0.0  ;;  %v221_v4 = vmul.f32 0.2, %v215_v1 }
   0x3   :  { %vm220_vm2 = vcmp.ge.f32.partialorder %v217_v2, 0.0  ;;  %v223_v5 = vmul.f32 0.2, %v217_v2  ;;  %v1552_v9 = vld [vmem:[%s2257_s0 + $0x58] sm:$0xff]  ;;  %v1551_v10 = vld [vmem:[%s2257_s0 + $0x50] sm:$0xff]  ;;  %v1550_v13 = vld [vmem:[%s2257_s0 + $0x48] sm:$0xff] }
   0x4   :  { %v225_v6 = vsel %vm219_vm0, %v216_v0, %v222_v3  ;;  %v224_v7 = vsel %vm218_vm1, %v215_v1, %v221_v4  ;;  %v440_v11 = vmul.f32 0.2, %v1552_v9  ;;  %v439_v12 = vmul.f32 0.2, %v1551_v10  ;;  %v108_v18 = vld [vmem:[%s2257_s0 + $0x10] sm:$0xff]  ;;  %v107_v19 = vld [vmem:[%s2257_s0 + $0x8] sm:$0xff] }
   0x5   :  { %232 = vrot.lane.b32.xlu0 %v225_v6, %s1646_s27  ;;  %230 = vrot.lane.b32.xlu1 %v224_v7, %s1646_s27  ;;  %v226_v8 = vsel %vm220_vm2, %v217_v2, %v223_v5  ;;  %vm437_vm3 = vcmp.ge.f32.partialorder %v1552_v9, 0.0  ;;  %vm436_vm4 = vcmp.ge.f32.partialorder %v1551_v10, 0.0  ;;  %v438_v16 = vmul.f32 0.2, %v1550_v13  ;;  %v106_v24 = vld [vmem:[%s2257_s0] sm:$0xff]  ;;  %v1539_v28 = vld [vmem:[%s2257_s0 + $0x38] sm:$0xff] }
   0x6   :  { %v443_v14 = vsel %vm437_vm3, %v1552_v9, %v440_v11  ;;  %v442_v15 = vsel %vm436_vm4, %v1551_v10, %v439_v12  ;;  %vm435_vm5 = vcmp.ge.f32.partialorder %v1550_v13, 0.0  ;;  %v114_v20 = vmul.f32 0.2, %v108_v18  ;;  %v1540_v27 = vld [vmem:[%s2257_s0 + $0x40] sm:$0xff]  ;;  %v1538_v31 = vld [vmem:[%s2257_s0 + $0x30] sm:$0xff]  ;;  %s1651_s0 = smov 109  }
   0x7   :  { %v441_v17 = vsel %vm435_vm5, %v1550_v13, %v438_v16  ;;  %v113_v21 = vmul.f32 0.2, %v107_v19  ;;  %vm111_vm6 = vcmp.ge.f32.partialorder %v108_v18, 0.0  ;;  %vm110_vm7 = vcmp.ge.f32.partialorder %v107_v19, 0.0  ;;  %s1652_s25 = smov 110   ;;  %s1653_s26 = smov 111  }
   0x8   :  { %v117_v22 = vsel %vm111_vm6, %v108_v18, %v114_v20  ;;  %v112_v25 = vmul.f32 0.2, %v106_v24  ;;  %vm109_vm8 = vcmp.ge.f32.partialorder %v106_v24, 0.0  ;;  %v332_v29 = vmul.f32 0.2, %v1540_v27  ;;  %s1656_s29 = smov 14  }
   0x9   :  { %234 = vrot.lane.b32.xlu0 %v226_v8, %s1646_s27  ;;  %205 = vrot.lane.b32.xlu1 %v225_v6, %s1647_s28  ;;  %v116_v23 = vsel %vm110_vm7, %v107_v19, %v113_v21  ;;  %v331_v30 = vmul.f32 0.2, %v1539_v28  ;;  %vm329_vm9 = vcmp.ge.f32.partialorder %v1540_v27, 0.0  ;;  %vm328_vm10 = vcmp.ge.f32.partialorder %v1539_v28, 0.0  ;;  %s1657_s30 = smov 16   ;;  %s1658_s7 = smov 15  }
   0xa   :  { %v115_v26 = vsel %vm109_vm8, %v106_v24, %v112_v25  ;;  %v335_v32 = vsel %vm329_vm9, %v1540_v27, %v332_v29  ;;  %v330_v34 = vmul.f32 0.2, %v1538_v31  ;;  %vm327_vm11 = vcmp.ge.f32.partialorder %v1538_v31, 0.0  ;;  %s1659_s8 = smov 125   ;;  %s1660_s9 = smov 126  }
   0xb   :  { %v334_v33 = vsel %vm328_vm10, %v1539_v28, %v331_v30  ;;  %s1661_s10 = smov 127   ;;  %s1664_s14 = smov 30   ;;  %vm862_vm0 = vcmask 113664   ;;  %vm824_vm1 = vcmask 130048   ;;  %vm744_vm2 = vcmask 236544  }
   0xc   :  { %v333_v35 = vsel %vm327_vm11, %v1538_v31, %v330_v34  ;;  %s1665_s15 = smov 32   ;;  %vm957_vm3 = vcmask 891904   ;;  %vm938_vm4 = vcmask 900096   ;;  %vm919_vm5 = vcmask 908288  }
   0xd   :  { %207 = vrot.lane.b32.xlu0 %v226_v8, %s1647_s28  ;;  %203 = vrot.lane.b32.xlu1 %v224_v7, %s1647_s28  ;;  %vm900_vm6 = vcmask 916480   ;;  %vm881_vm7 = vcmask 105472   ;;  %vm843_vm8 = vcmask 121856   ;;  %vm805_vm9 = vcmask 1022976  }
   0xe   :  { %vm786_vm10 = vcmask 1031168   ;;  %vm767_vm11 = vcmask 1039360  }
  0x11   :  { %180 = vrot.lane.b32.xlu1 %v226_v8, %s1648_s11  ;;  %178 = vrot.lane.b32.xlu0 %v225_v6, %s1648_s11 }
  0x15   :  { %451 = vrot.lane.b32.xlu1 %v443_v14, %s1646_s27  ;;  %449 = vrot.lane.b32.xlu0 %v442_v15, %s1646_s27 }
  0x19   :  { %447 = vrot.lane.b32.xlu1 %v441_v17, %s1646_s27  ;;  %176 = vrot.lane.b32.xlu0 %v224_v7, %s1648_s11 }
  0x1d   :  { %153 = vrot.lane.b32.xlu1 %v226_v8, %s1649_s12  ;;  %151 = vrot.lane.b32.xlu0 %v225_v6, %s1649_s12 }
  0x21   :  { %424 = vrot.lane.b32.xlu1 %v443_v14, %s1647_s28  ;;  %422 = vrot.lane.b32.xlu0 %v442_v15, %s1647_s28 }
  0x25   :  { %420 = vrot.lane.b32.xlu1 %v441_v17, %s1647_s28  ;;  %149 = vrot.lane.b32.xlu0 %v224_v7, %s1649_s12 }
  0x29   :  { %125 = vrot.lane.b32.xlu1 %v117_v22, %s1646_s27  ;;  %123 = vrot.lane.b32.xlu0 %v116_v23, %s1646_s27 }
  0x2d   :  { %397 = vrot.lane.b32.xlu1 %v443_v14, %s1648_s11  ;;  %395 = vrot.lane.b32.xlu0 %v442_v15, %s1648_s11 }
  0x31   :  { %393 = vrot.lane.b32.xlu1 %v441_v17, %s1648_s11  ;;  %121 = vrot.lane.b32.xlu0 %v115_v26, %s1646_s27 }
  0x35   :  { %97 = vrot.lane.b32.xlu1 %v117_v22, %s1647_s28  ;;  %95 = vrot.lane.b32.xlu0 %v116_v23, %s1647_s28 }
  0x39   :  { %370 = vrot.lane.b32.xlu1 %v443_v14, %s1649_s12  ;;  %368 = vrot.lane.b32.xlu0 %v442_v15, %s1649_s12 }
  0x3d   :  { %366 = vrot.lane.b32.xlu1 %v441_v17, %s1649_s12  ;;  %93 = vrot.lane.b32.xlu0 %v115_v26, %s1647_s28 }
  0x41   :  { %69 = vrot.lane.b32.xlu1 %v117_v22, %s1648_s11  ;;  %67 = vrot.lane.b32.xlu0 %v116_v23, %s1648_s11 }
  0x45   :  { %343 = vrot.lane.b32.xlu1 %v335_v32, %s1646_s27  ;;  %341 = vrot.lane.b32.xlu0 %v334_v33, %s1646_s27 }
  0x49   :  { %339 = vrot.lane.b32.xlu1 %v333_v35, %s1646_s27  ;;  %65 = vrot.lane.b32.xlu0 %v115_v26, %s1648_s11  ;;  %s1654_s27 = smov 112  }
  0x4d   :  { %41 = vrot.lane.b32.xlu1 %v117_v22, %s1649_s12  ;;  %39 = vrot.lane.b32.xlu0 %v116_v23, %s1649_s12 }
  0x51   :  { %316 = vrot.lane.b32.xlu1 %v335_v32, %s1647_s28  ;;  %314 = vrot.lane.b32.xlu0 %v334_v33, %s1647_s28 }
  0x55   :  { %312 = vrot.lane.b32.xlu1 %v333_v35, %s1647_s28  ;;  %37 = vrot.lane.b32.xlu0 %v115_v26, %s1649_s12  ;;  %s1655_s28 = smov 13  }
  0x59   :  { %289 = vrot.lane.b32.xlu1 %v335_v32, %s1648_s11  ;;  %287 = vrot.lane.b32.xlu0 %v334_v33, %s1648_s11 }
  0x5d   :  { %260 = vrot.lane.b32.xlu1 %v334_v33, %s1649_s12  ;;  %285 = vrot.lane.b32.xlu0 %v333_v35, %s1648_s11  ;;  %s1662_s11 = smov 29  }
  0x61   :  { %258 = vrot.lane.b32.xlu1 %v333_v35, %s1649_s12  ;;  %262 = vrot.lane.b32.xlu0 %v335_v32, %s1649_s12 }
  0x65   :  { %1577 = vrot.lane.b32.xlu1 %v1650_v36, %s1651_s0  ;;  %1582 = vrot.lane.b32.xlu0 %v1650_v36, %s1652_s25 }
  0x69   :  { %1587 = vrot.lane.b32.xlu1 %v1650_v36, %s1653_s26  ;;  %1592 = vrot.lane.b32.xlu0 %v1650_v36, %s1654_s27 }
  0x6d   :  { %1597 = vrot.lane.b32.xlu1 %v1650_v36, %s1655_s28  ;;  %1602 = vrot.lane.b32.xlu0 %v1650_v36, %s1656_s29 }
  0x71   :  { %1612 = vrot.lane.b32.xlu1 %v1650_v36, %s1657_s30  ;;  %1607 = vrot.lane.b32.xlu0 %v1650_v36, %s1658_s7 }
  0x75   :  { %1617 = vrot.lane.b32.xlu1 %v1650_v36, %s1659_s8  ;;  %1622 = vrot.lane.b32.xlu0 %v1650_v36, %s1660_s9 }
  0x77   :  { %v233_v37 = vpop.permute.xlu0 %232  ;;  %v231_v38 = vpop.permute.xlu1 %230 }
  0x78   :  { %v236_v42 = vsel %vm127_vm12, %v231_v38, %v233_v37 }
  0x79   :  { %1627 = vrot.lane.b32.xlu1 %v1650_v36, %s1661_s10  ;;  %1632 = vrot.lane.b32.xlu0 %v1650_v36, %s1662_s11 }
  0x7b   :  { %v235_v39 = vpop.permute.xlu0 %234  ;;  %v206_v40 = vpop.permute.xlu1 %205 }
  0x7c   :  { %v237_v41 = vsel %vm127_vm12, %v233_v37, %v235_v39 }
  0x7d   :  { %511 = vmatprep.subr.mxu0 %v237_v41  ;;  %1637 = vrot.lane.b32.xlu0 %v1650_v36, %s1664_s14 }
  0x7e   :  { %512 = vmatpush1.msra.mxu0 %v236_v42  ;;  %v459_v42 = vld [vmem:[%s2258_s1] sm:$0xff]  ;;  %s1663_s1 = smov 31  }
  0x7f   :  { %v208_v43 = vpop.permute.xlu0 %207  ;;  %v204_v44 = vpop.permute.xlu1 %203  ;;  %1642 = vrot.lane.b32.xlu1 %v1650_v36, %s1663_s1 }
  0x80   :  { %v210_v45 = vsel %vm99_vm13, %v206_v40, %v208_v43  ;;  %v209_v46 = vsel %vm99_vm13, %v204_v44, %v206_v40 }
  0x81   :  { %513 = vmatprep.subr.mxu0 %v210_v45  ;;  %681 = vrot.lane.b32.xlu0 %v1650_v36, %s1665_s15 }
  0x82   :  { %514 = vmatpush1.msra.mxu0 %v209_v46 }
  0x83   :  { %v181_v47 = vpop.permute.xlu1 %180  ;;  %v179_v48 = vpop.permute.xlu0 %178 }
  0x84   :  { %v183_v49 = vsel %vm71_vm14, %v179_v48, %v181_v47 }
  0x85   :  { %515 = vmatprep.subr.mxu0 %v183_v49 }
  0x87   :  { %v452_v50 = vpop.permute.xlu1 %451  ;;  %v450_v51 = vpop.permute.xlu0 %449 }
  0x88   :  { %v454_v52 = vsel %vm127_vm12, %v450_v51, %v452_v50 }
  0x89   :  { %582 = vmatprep.subr.mxu1 %v454_v52 }
  0x8b   :  { %v448_v53 = vpop.permute.xlu1 %447  ;;  %v177_v54 = vpop.permute.xlu0 %176 }
  0x8c   :  { %v182_v55 = vsel %vm71_vm14, %v177_v54, %v179_v48  ;;  %v453_v56 = vsel %vm127_vm12, %v448_v53, %v450_v51 }
  0x8d   :  { %516 = vmatpush1.msra.mxu0 %v182_v55  ;;  %583 = vmatpush1.msra.mxu1 %v453_v56  ;;  %v643_v55 = vlaneseq }
  0x8f   :  { %v154_v57 = vpop.permute.xlu1 %153  ;;  %v152_v58 = vpop.permute.xlu0 %151  ;;  %v1857_v56 = vshrl.u32 %v643_v55, 7 }
  0x90   :  { %v156_v59 = vsel %vm43_vm15, %v152_v58, %v154_v57 }
  0x91   :  { %517 = vmatprep.subr.mxu0 %v156_v59  ;;  %2270 = vst [vmem:[#allocation5_spill] sm:$0xff] %v1857_v56  ;;  %v2267_v57 = vsub.s32 0, %v1857_v56 }
  0x93   :  { %v425_v60 = vpop.permute.xlu1 %424  ;;  %v423_v61 = vpop.permute.xlu0 %422 }
  0x94   :  { %v427_v62 = vsel %vm99_vm13, %v423_v61, %v425_v60 }
  0x95   :  { %584 = vmatprep.subr.mxu1 %v427_v62 }
  0x97   :  { %v421_v63 = vpop.permute.xlu1 %420  ;;  %v150_v0 = vpop.permute.xlu0 %149 }
  0x98   :  { %v155_v1 = vsel %vm43_vm15, %v150_v0, %v152_v58  ;;  %v426_v2 = vsel %vm99_vm13, %v421_v63, %v423_v61  ;;  %v641_v58 = vld [vmem:[%s2259_s3] sm:$0xf]  ;;  %v2265_v63 = vsub.s32 2, %v1857_v56 }
  0x99   :  { %518 = vmatpush1.msra.mxu0 %v155_v1  ;;  %585 = vmatpush1.msra.mxu1 %v426_v2  ;;  %v646_v59 = vrot.slane %v641_v58, %v2267_v57 }
  0x9a   :  { %v654_v0 = vrot.slane %v641_v58, %v2265_v63 }
  0x9b   :  { %v126_v3 = vpop.permute.xlu1 %125  ;;  %v124_v4 = vpop.permute.xlu0 %123 }
  0x9c   :  { %v129_v5 = vsel %vm127_vm12, %v124_v4, %v126_v3 }
  0x9d   :  { %519 = vmatprep.subr.mxu0 %v129_v5 }
  0x9f   :  { %v398_v6 = vpop.permute.xlu1 %397  ;;  %v396_v7 = vpop.permute.xlu0 %395 }
  0xa0   :  { %v400_v8 = vsel %vm71_vm14, %v396_v7, %v398_v6 }
  0xa1   :  { %586 = vmatprep.subr.mxu1 %v400_v8 }
  0xa3   :  { %v394_v9 = vpop.permute.xlu1 %393  ;;  %v122_v10 = vpop.permute.xlu0 %121 }
  0xa4   :  { %v128_v11 = vsel %vm127_vm12, %v122_v10, %v124_v4  ;;  %v399_v12 = vsel %vm71_vm14, %v394_v9, %v396_v7  ;;  %v2266_v4 = vsub.s32 1, %v1857_v56  ;;  %v2264_v9 = vsub.s32 3, %v1857_v56 }
  0xa5   :  { %520 = vmatpush1.msra.mxu0 %v128_v11  ;;  %587 = vmatpush1.msra.mxu1 %v399_v12 }
  0xa6   :  { %v650_v7 = vrot.slane %v641_v58, %v2266_v4  ;;  %v658_v12 = vrot.slane %v641_v58, %v2264_v9 }
  0xa7   :  { %v98_v13 = vpop.permute.xlu1 %97  ;;  %v96_v14 = vpop.permute.xlu0 %95 }
  0xa8   :  { %v101_v15 = vsel %vm99_vm13, %v96_v14, %v98_v13 }
  0xa9   :  { %521 = vmatprep.subr.mxu0 %v101_v15 }
  0xab   :  { %v371_v16 = vpop.permute.xlu1 %370  ;;  %v369_v17 = vpop.permute.xlu0 %368 }
  0xac   :  { %v373_v18 = vsel %vm43_vm15, %v369_v17, %v371_v16 }
  0xad   :  { %588 = vmatprep.subr.mxu1 %v373_v18 }
  0xaf   :  { %v367_v19 = vpop.permute.xlu1 %366  ;;  %v94_v20 = vpop.permute.xlu0 %93 }
  0xb0   :  { %v100_v21 = vsel %vm99_vm13, %v94_v20, %v96_v14  ;;  %v372_v22 = vsel %vm43_vm15, %v367_v19, %v369_v17 }
  0xb1   :  { %522 = vmatpush1.msra.mxu0 %v100_v21  ;;  %589 = vmatpush1.msra.mxu1 %v372_v22 }
  0xb3   :  { %v70_v23 = vpop.permute.xlu1 %69  ;;  %v68_v24 = vpop.permute.xlu0 %67 }
  0xb4   :  { %v73_v25 = vsel %vm71_vm14, %v68_v24, %v70_v23 }
  0xb5   :  { %523 = vmatprep.subr.mxu0 %v73_v25 }
  0xb7   :  { %v344_v26 = vpop.permute.xlu1 %343  ;;  %v342_v27 = vpop.permute.xlu0 %341 }
  0xb8   :  { %v346_v28 = vsel %vm127_vm12, %v342_v27, %v344_v26 }
  0xb9   :  { %590 = vmatprep.subr.mxu1 %v346_v28 }
  0xbb   :  { %v340_v29 = vpop.permute.xlu1 %339  ;;  %v66_v30 = vpop.permute.xlu0 %65 }
  0xbc   :  { %v72_v31 = vsel %vm71_vm14, %v66_v30, %v68_v24  ;;  %v345_v32 = vsel %vm127_vm12, %v340_v29, %v342_v27 }
  0xbd   :  { %524 = vmatpush1.msra.mxu0 %v72_v31  ;;  %591 = vmatpush1.msra.mxu1 %v345_v32 }
  0xbf   :  { %v42_v33 = vpop.permute.xlu1 %41  ;;  %v40_v34 = vpop.permute.xlu0 %39 }
  0xc0   :  { %v45_v35 = vsel %vm43_vm15, %v40_v34, %v42_v33 }
  0xc1   :  { %525 = vmatprep.subr.mxu0 %v45_v35 }
  0xc3   :  { %v317_v37 = vpop.permute.xlu1 %316  ;;  %v315_v38 = vpop.permute.xlu0 %314 }
  0xc4   :  { %v319_v39 = vsel %vm99_vm13, %v315_v38, %v317_v37 }
  0xc5   :  { %592 = vmatprep.subr.mxu1 %v319_v39 }
  0xc7   :  { %v313_v40 = vpop.permute.xlu1 %312  ;;  %v38_v41 = vpop.permute.xlu0 %37 }
  0xc8   :  { %v44_v43 = vsel %vm43_vm15, %v38_v41, %v40_v34  ;;  %v318_v44 = vsel %vm99_vm13, %v313_v40, %v315_v38  ;;  %vm706_vm13 = vcmask 252928  }
  0xc9   :  { %526 = vmatpush1.msra.mxu0 %v44_v43  ;;  %593 = vmatpush1.msra.mxu1 %v318_v44 }
  0xca   :  { %1553 = vmatmul.mubr.msk.f32.vlgmr.msra.gmra.mxu0 %vm127_vm12, %v459_v42 }
  0xcb   :  { %v290_v45 = vpop.permute.xlu1 %289  ;;  %v288_v46 = vpop.permute.xlu0 %287  ;;  %1367 = vmatprep.mubr.f32.mxu0 %v1650_v36 }
  0xcc   :  { %v292_v47 = vsel %vm71_vm14, %v288_v46, %v290_v45 }
  0xcd   :  { %594 = vmatprep.subr.mxu1 %v292_v47 }
  0xcf   :  { %v261_v48 = vpop.permute.xlu1 %260  ;;  %v286_v49 = vpop.permute.xlu0 %285 }
  0xd0   :  { %v291_v50 = vsel %vm71_vm14, %v286_v49, %v288_v46  ;;  %vm687_vm14 = vcmask 261120  }
  0xd1   :  { %595 = vmatpush1.msra.mxu1 %v291_v50 }
  0xd3   :  { %v259_v51 = vpop.permute.xlu1 %258  ;;  %v263_v52 = vpop.permute.xlu0 %262 }
  0xd4   :  { %v265_v53 = vsel %vm43_vm15, %v261_v48, %v263_v52  ;;  %v264_v54 = vsel %vm43_vm15, %v259_v51, %v261_v48 }
  0xd5   :  { %596 = vmatprep.subr.mxu1 %v265_v53 }
  0xd6   :  { %597 = vmatpush1.msra.mxu1 %v264_v54 }
  0xd7   :  { %1554 = vmatmul.mubr.msk.f32.vlgmr.msra.gmra.mxu1 %vm127_vm12, %v459_v42  ;;  %v1952_v14 = vpop.permute.xlu1 %1577  ;;  %v1954_v15 = vpop.permute.xlu0 %1582  ;;  %vm725_vm12 = vcmask 244736  }
  0xd8   :  { %1438 = vmatprep.mubr.f32.mxu1 %v1650_v36 }
  0xdb   :  { %v1964_v16 = vpop.permute.xlu1 %1587  ;;  %v1966_v17 = vpop.permute.xlu0 %1592 }
  0xdc   :  { %v1594_v57 = vunpack.i.l.bf16 %v1966_v17 }
  0xdf   :  { %v1972_v18 = vpop.permute.xlu1 %1597  ;;  %v1974_v19 = vpop.permute.xlu0 %1602 }
  0xe0   :  { %v1604_v34 = vunpack.i.l.bf16 %v1974_v19 }
  0xe3   :  { %v1984_v20 = vpop.permute.xlu1 %1612  ;;  %v1986_v21 = vpop.permute.xlu0 %1607 }
  0xe4   :  { %v1615_v44 = vunpack.i.h.bf16 %v1984_v20 }
  0xe7   :  { %v1992_v22 = vpop.permute.xlu1 %1617  ;;  %v1994_v23 = vpop.permute.xlu0 %1622 }
  0xeb   :  { %v2004_v24 = vpop.permute.xlu1 %1627  ;;  %v2006_v25 = vpop.permute.xlu0 %1632 }
  0xec   :  { %v1634_v52 = vunpack.i.l.bf16 %v2006_v25 }
  0xef   :  { %v2014_v27 = vpop.permute.xlu0 %1637 }
  0xf1   :  { %v2012_v26 = vpop.permute.xlu1 %1642 }
  0xf3   :  { %v2020_v29 = vpop.permute.xlu0 %681 }
 0x18a   :  { %v561_v60 = vpop.f32.mrf.mxu0 }
 0x18b   :  { %v637_v61 = vmax.f32 %v561_v60, 0.0 }
 0x18c   :  { %v563_v5 = vpop.f32.mrf.mxu0 }
 0x18d   :  { %v1865_v62 = vmul.f32 %v646_v59, %v637_v61  ;;  %v638_v6 = vmax.f32 %v563_v5, 0.0 }
 0x18f   :  { %932 = vrot.lane.b32.xlu1 %v1865_v62, %s1652_s25  ;;  %951 = vrot.lane.b32.xlu0 %v1865_v62, %s1651_s0  ;;  %v1933_v8 = vmul.f32 %v650_v7, %v638_v6  ;;  %v1579_v6 = vunpack.i.l.bf16 %v1952_v14 }
 0x193   :  { %913 = vrot.lane.b32.xlu1 %v1865_v62, %s1653_s26 }
 0x197   :  { %v632_v1 = vpop.f32.mrf.mxu1 }
 0x198   :  { %v639_v2 = vmax.f32 %v632_v1, 0.0 }
 0x199   :  { %v634_v10 = vpop.f32.mrf.mxu1 }
 0x19a   :  { %v1876_v3 = vmul.f32 %v654_v0, %v639_v2  ;;  %v640_v11 = vmax.f32 %v634_v10, 0.0 }
 0x19c   :  { %1208 = vrot.lane.b32.xlu1 %v1876_v3, %s1652_s25  ;;  %1226 = vrot.lane.b32.xlu0 %v1876_v3, %s1651_s0  ;;  %v1946_v13 = vmul.f32 %v658_v12, %v640_v11  ;;  %v1584_v11 = vunpack.i.l.bf16 %v1954_v15 }
 0x1a0   :  { %858 = vrot.lane.b32.xlu1 %v1865_v62, %s1656_s29  ;;  %894 = vrot.lane.b32.xlu0 %v1865_v62, %s1654_s27 }
 0x1a4   :  { %1172 = vrot.lane.b32.xlu1 %v1876_v3, %s1654_s27  ;;  %877 = vrot.lane.b32.xlu0 %v1865_v62, %s1655_s28 }
 0x1a8   :  { %820 = vrot.lane.b32.xlu1 %v1865_v62, %s1657_s30  ;;  %1190 = vrot.lane.b32.xlu0 %v1876_v3, %s1653_s26 }
 0x1ac   :  { %1138 = vrot.lane.b32.xlu1 %v1876_v3, %s1656_s29  ;;  %839 = vrot.lane.b32.xlu0 %v1865_v62, %s1658_s7 }
 0x1b0   :  { %1102 = vrot.lane.b32.xlu1 %v1876_v3, %s1657_s30  ;;  %1156 = vrot.lane.b32.xlu0 %v1876_v3, %s1655_s28 }
 0x1b4   :  { %780 = vrot.lane.b32.xlu1 %v1865_v62, %s1660_s9  ;;  %1120 = vrot.lane.b32.xlu0 %v1876_v3, %s1658_s7 }
 0x1b8   :  { %761 = vrot.lane.b32.xlu1 %v1865_v62, %s1661_s10  ;;  %799 = vrot.lane.b32.xlu0 %v1865_v62, %s1659_s8 }
 0x1bc   :  { %740 = vrot.lane.b32.xlu1 %v1865_v62, %s1662_s11  ;;  %1082 = vrot.lane.b32.xlu0 %v1876_v3, %s1659_s8 }
 0x1c0   :  { %1046 = vrot.lane.b32.xlu1 %v1876_v3, %s1661_s10  ;;  %1064 = vrot.lane.b32.xlu0 %v1876_v3, %s1660_s9 }
 0x1c4   :  { %702 = vrot.lane.b32.xlu1 %v1865_v62, %s1663_s1  ;;  %721 = vrot.lane.b32.xlu0 %v1865_v62, %s1664_s14 }
 0x1c8   :  { %1026 = vrot.lane.b32.xlu1 %v1876_v3, %s1662_s11  ;;  %683 = vrot.lane.b32.xlu0 %v1865_v62, %s1665_s15 }
 0x1cc   :  { %990 = vrot.lane.b32.xlu1 %v1876_v3, %s1663_s1  ;;  %1008 = vrot.lane.b32.xlu0 %v1876_v3, %s1664_s14 }
 0x1d0   :  { %934 = vrot.lane.b32.xlu1 %v1933_v8, %s1652_s25  ;;  %953 = vrot.lane.b32.xlu0 %v1933_v8, %s1651_s0 }
 0x1d4   :  { %896 = vrot.lane.b32.xlu1 %v1933_v8, %s1654_s27  ;;  %915 = vrot.lane.b32.xlu0 %v1933_v8, %s1653_s26 }
 0x1d8   :  { %1210 = vrot.lane.b32.xlu1 %v1946_v13, %s1652_s25  ;;  %1228 = vrot.lane.b32.xlu0 %v1946_v13, %s1651_s0 }
 0x1dc   :  { %879 = vrot.lane.b32.xlu1 %v1933_v8, %s1655_s28  ;;  %1192 = vrot.lane.b32.xlu0 %v1946_v13, %s1653_s26 }
 0x1e0   :  { %1174 = vrot.lane.b32.xlu1 %v1946_v13, %s1654_s27  ;;  %860 = vrot.lane.b32.xlu0 %v1933_v8, %s1656_s29 }
 0x1e4   :  { %841 = vrot.lane.b32.xlu1 %v1933_v8, %s1658_s7  ;;  %822 = vrot.lane.b32.xlu0 %v1933_v8, %s1657_s30 }
 0x1e8   :  { %1158 = vrot.lane.b32.xlu1 %v1946_v13, %s1655_s28  ;;  %1140 = vrot.lane.b32.xlu0 %v1946_v13, %s1656_s29 }
 0x1ec   :  { %1122 = vrot.lane.b32.xlu1 %v1946_v13, %s1658_s7  ;;  %801 = vrot.lane.b32.xlu0 %v1933_v8, %s1659_s8 }
 0x1f0   :  { %782 = vrot.lane.b32.xlu1 %v1933_v8, %s1660_s9  ;;  %1104 = vrot.lane.b32.xlu0 %v1946_v13, %s1657_s30 }
 0x1f4   :  { %1066 = vrot.lane.b32.xlu1 %v1946_v13, %s1660_s9  ;;  %763 = vrot.lane.b32.xlu0 %v1933_v8, %s1661_s10 }
 0x1f8   :  { %1048 = vrot.lane.b32.xlu1 %v1946_v13, %s1661_s10  ;;  %1084 = vrot.lane.b32.xlu0 %v1946_v13, %s1659_s8 }
 0x1fc   :  { %723 = vrot.lane.b32.xlu1 %v1933_v8, %s1664_s14  ;;  %742 = vrot.lane.b32.xlu0 %v1933_v8, %s1662_s11 }
 0x200   :  { %685 = vrot.lane.b32.xlu1 %v1933_v8, %s1665_s15  ;;  %704 = vrot.lane.b32.xlu0 %v1933_v8, %s1663_s1 }
 0x201   :  { %v933_v28 = vpop.permute.xlu1 %932  ;;  %v952_v31 = vpop.permute.xlu0 %951 }
 0x204   :  { %1010 = vrot.lane.b32.xlu1 %v1946_v13, %s1664_s14  ;;  %1028 = vrot.lane.b32.xlu0 %v1946_v13, %s1662_s11 }
 0x205   :  { %v914_v30 = vpop.permute.xlu1 %913 }
 0x208   :  { %972 = vrot.lane.b32.xlu1 %v1876_v3, %s1665_s15  ;;  %992 = vrot.lane.b32.xlu0 %v1946_v13, %s1663_s1 }
 0x20c   :  { %970 = vrot.lane.b32.xlu1 %v1650_v36, %s1665_s15  ;;  %974 = vrot.lane.b32.xlu0 %v1946_v13, %s1665_s15 }
 0x20e   :  { %v2034_v32 = vpop.permute.xlu1 %1208  ;;  %v2036_v33 = vpop.permute.xlu0 %1226 }
 0x212   :  { %v2039_v35 = vpop.permute.xlu1 %858  ;;  %v895_v37 = vpop.permute.xlu0 %894 }
 0x213   :  { %v2043_v38 = vsel %vm862_vm0, %v1604_v34, %v2039_v35 }
 0x216   :  { %v2045_v39 = vpop.permute.xlu1 %1172  ;;  %v2047_v36 = vpop.permute.xlu0 %877 }
 0x21a   :  { %v2049_v40 = vpop.permute.xlu1 %820  ;;  %v2051_v41 = vpop.permute.xlu0 %1190 }
 0x21e   :  { %v2053_v42 = vpop.permute.xlu1 %1138  ;;  %v2055_v43 = vpop.permute.xlu0 %839 }
 0x222   :  { %v2058_v45 = vpop.permute.xlu1 %1102  ;;  %v2060_v46 = vpop.permute.xlu0 %1156 }
 0x223   :  { %v2064_v47 = vsel %vm824_vm1, %v1615_v44, %v2058_v45  ;;  %v1589_v44 = vunpack.i.l.bf16 %v1964_v16 }
 0x226   :  { %v2066_v48 = vpop.permute.xlu1 %780  ;;  %v2068_v49 = vpop.permute.xlu0 %1120 }
 0x22a   :  { %v2070_v50 = vpop.permute.xlu1 %761  ;;  %v2072_v51 = vpop.permute.xlu0 %799 }
 0x22e   :  { %v2075_v53 = vpop.permute.xlu1 %740  ;;  %v2077_v54 = vpop.permute.xlu0 %1082 }
 0x22f   :  { %v2081_v55 = vsel %vm744_vm2, %v1634_v52, %v2075_v53 }
 0x232   :  { %v2083_v58 = vpop.permute.xlu1 %1046  ;;  %v2085_v59 = vpop.permute.xlu0 %1064 }
 0x236   :  { %v2087_v60 = vpop.permute.xlu1 %702  ;;  %v2089_v61 = vpop.permute.xlu0 %721 }
 0x23a   :  { %v2091_v0 = vpop.permute.xlu1 %1026  ;;  %v2093_v1 = vpop.permute.xlu0 %683 }
 0x23e   :  { %v2095_v2 = vpop.permute.xlu1 %990  ;;  %v2097_v5 = vpop.permute.xlu0 %1008 }
 0x242   :  { %v935_v7 = vpop.permute.xlu1 %934  ;;  %v954_v10 = vpop.permute.xlu0 %953 }
 0x243   :  { %v958_v12 = vsel %vm957_vm3, %v952_v31, %v954_v10  ;;  %v959_v34 = vsel %vm957_vm3, %v954_v10, %v1579_v6  ;;  %v940_v52 = vsel %vm938_vm4, %v935_v7, %v1584_v11  ;;  %v939_v9 = vsel %vm938_vm4, %v933_v28, %v935_v7 }
 0x244   :  { %1303 = vmatprep.subr.mxu0 %v959_v34  ;;  %v1580_v6 = vunpack.i.h.bf16 %v1952_v14 }
 0x245   :  { %1304 = vmatpush1.msra.mxu0 %v958_v12  ;;  %v1585_v12 = vunpack.i.h.bf16 %v1954_v15 }
 0x246   :  { %v897_v63 = vpop.permute.xlu1 %896  ;;  %v916_v4 = vpop.permute.xlu0 %915  ;;  %1305 = vmatprep.subr.mxu0 %v940_v52 }
 0x247   :  { %v920_v56 = vsel %vm919_vm5, %v914_v30, %v916_v4  ;;  %1306 = vmatpush1.msra.mxu0 %v939_v9  ;;  %v921_v31 = vsel %vm919_vm5, %v916_v4, %v1589_v44  ;;  %v902_v10 = vsel %vm900_vm6, %v897_v63, %v1594_v57  ;;  %v901_v11 = vsel %vm900_vm6, %v895_v37, %v897_v63 }
 0x248   :  { %1307 = vmatprep.subr.mxu0 %v921_v31  ;;  %v1590_v4 = vunpack.i.h.bf16 %v1964_v16  ;;  %v1599_v57 = vunpack.i.l.bf16 %v1972_v18  ;;  %v1595_v44 = vunpack.i.h.bf16 %v1966_v17  ;;  %v1609_v17 = vunpack.i.l.bf16 %v1986_v21 }
 0x249   :  { %1308 = vmatpush1.msra.mxu0 %v920_v56 }
 0x24a   :  { %v1211_v28 = vpop.permute.xlu1 %1210  ;;  %v1229_v7 = vpop.permute.xlu0 %1228  ;;  %1309 = vmatprep.subr.mxu0 %v902_v10  ;;  %v882_v37 = vsel %vm881_vm7, %v1599_v57, %v2047_v36 }
 0x24b   :  { %v1232_v34 = vsel %vm957_vm3, %v2036_v33, %v1229_v7  ;;  %1310 = vmatpush1.msra.mxu0 %v901_v11  ;;  %v1233_v9 = vsel %vm957_vm3, %v1229_v7, %v1580_v6  ;;  %v1215_v56 = vsel %vm938_vm4, %v1211_v28, %v1585_v12  ;;  %v1214_v63 = vsel %vm938_vm4, %v2034_v32, %v1211_v28 }
 0x24c   :  { %1374 = vmatprep.subr.mxu1 %v1233_v9  ;;  %v1605_v9 = vunpack.i.h.bf16 %v1974_v19 }
 0x24d   :  { %1375 = vmatpush1.msra.mxu1 %v1232_v34 }
 0x24e   :  { %v880_v14 = vpop.permute.xlu1 %879  ;;  %v1193_v15 = vpop.permute.xlu0 %1192  ;;  %1376 = vmatprep.subr.mxu1 %v1215_v56  ;;  %v1142_v56 = vsel %vm862_vm0, %v1605_v9, %v2053_v42 }
 0x24f   :  { %v1196_v30 = vsel %vm919_vm5, %v2051_v41, %v1193_v15  ;;  %1377 = vmatpush1.msra.mxu1 %v1214_v63  ;;  %v883_v33 = vsel %vm881_vm7, %v2047_v36, %v880_v14  ;;  %v1197_v16 = vsel %vm919_vm5, %v1193_v15, %v1590_v4  ;;  %v1619_v4 = vunpack.i.l.bf16 %v1992_v22 }
 0x250   :  { %1311 = vmatprep.subr.mxu0 %v883_v33  ;;  %1378 = vmatprep.subr.mxu1 %v1197_v16  ;;  %vm1517_vm5 = vcmask 7168  }
 0x251   :  { %1312 = vmatpush1.msra.mxu0 %v882_v37  ;;  %1379 = vmatpush1.msra.mxu1 %v1196_v30 }
 0x252   :  { %v1175_v32 = vpop.permute.xlu1 %1174  ;;  %v861_v52 = vpop.permute.xlu0 %860 }
 0x253   :  { %v1178_v41 = vsel %vm900_vm6, %v2045_v39, %v1175_v32  ;;  %v864_v31 = vsel %vm862_vm0, %v2039_v35, %v861_v52  ;;  %v1179_v6 = vsel %vm900_vm6, %v1175_v32, %v1595_v44  ;;  %v1614_v39 = vunpack.i.l.bf16 %v1984_v20 }
 0x254   :  { %1313 = vmatprep.subr.mxu0 %v864_v31  ;;  %1380 = vmatprep.subr.mxu1 %v1179_v6  ;;  %v844_v35 = vsel %vm843_vm8, %v1609_v17, %v2055_v43  ;;  %v1620_v52 = vunpack.i.h.bf16 %v1992_v22  ;;  %v1625_v31 = vunpack.i.h.bf16 %v1994_v23  ;;  %vm1519_vm6 = vcmask 11264  }
 0x255   :  { %1314 = vmatpush1.msra.mxu0 %v2043_v38  ;;  %1381 = vmatpush1.msra.mxu1 %v1178_v41  ;;  %v1600_v38 = vunpack.i.h.bf16 %v1972_v18  ;;  %v825_v7 = vsel %vm824_vm1, %v1614_v39, %v2049_v40 }
 0x256   :  { %v842_v36 = vpop.permute.xlu1 %841  ;;  %v823_v10 = vpop.permute.xlu0 %822 }
 0x257   :  { %v845_v11 = vsel %vm843_vm8, %v2055_v43, %v842_v36  ;;  %v826_v28 = vsel %vm824_vm1, %v2049_v40, %v823_v10  ;;  %v1160_v43 = vsel %vm881_vm7, %v1600_v38, %v2060_v46  ;;  %v1610_v40 = vunpack.i.h.bf16 %v1986_v21 }
 0x258   :  { %1315 = vmatprep.subr.mxu0 %v845_v11  ;;  %v1624_v21 = vunpack.i.l.bf16 %v1994_v23  ;;  %v1644_v10 = vunpack.i.l.bf16 %v2012_v26 }
 0x259   :  { %1316 = vmatpush1.msra.mxu0 %v844_v35  ;;  %v1124_v15 = vsel %vm843_vm8, %v1610_v40, %v2068_v49  ;;  %v1238_v35 = vld [vmem:[%s2260_s2] sm:$0xff] }
 0x25a   :  { %v1159_v12 = vpop.permute.xlu1 %1158  ;;  %v1141_v34 = vpop.permute.xlu0 %1140  ;;  %1317 = vmatprep.subr.mxu0 %v826_v28 }
 0x25b   :  { %1318 = vmatpush1.msra.mxu0 %v825_v7  ;;  %v1161_v20 = vsel %vm881_vm7, %v2060_v46, %v1159_v12  ;;  %v1143_v18 = vsel %vm862_vm0, %v2053_v42, %v1141_v34  ;;  %v1640_v7 = vunpack.i.h.bf16 %v2014_v27 }
 0x25c   :  { %1382 = vmatprep.subr.mxu1 %v1161_v20 }
 0x25d   :  { %1383 = vmatpush1.msra.mxu1 %v1160_v43 }
 0x25e   :  { %v1123_v57 = vpop.permute.xlu1 %1122  ;;  %v802_v63 = vpop.permute.xlu0 %801  ;;  %1384 = vmatprep.subr.mxu1 %v1143_v18  ;;  %v1666_v18 = vmov 0  }
 0x25f   :  { %v806_v19 = vsel %vm805_vm9, %v2072_v51, %v802_v63  ;;  %1385 = vmatpush1.msra.mxu1 %v1142_v56  ;;  %v807_v46 = vsel %vm805_vm9, %v802_v63, %v1619_v4  ;;  %v1125_v14 = vsel %vm843_vm8, %v2068_v49, %v1123_v57  ;;  %v1629_v49 = vunpack.i.l.bf16 %v2004_v24  ;;  %v2271_v56 = vld [vmem:[#allocation5_spill] sm:$0xff] }
 0x260   :  { %1319 = vmatprep.subr.mxu0 %v807_v46  ;;  %1386 = vmatprep.subr.mxu1 %v1125_v14  ;;  %v2273_v63 = vsub.s32 1, %v2271_v56 }
 0x261   :  { %1320 = vmatpush1.msra.mxu0 %v806_v19  ;;  %1387 = vmatpush1.msra.mxu1 %v1124_v15 }
 0x262   :  { %v783_v42 = vpop.permute.xlu1 %782  ;;  %v1105_v30 = vpop.permute.xlu0 %1104 }
 0x263   :  { %v787_v51 = vsel %vm786_vm10, %v2066_v48, %v783_v42  ;;  %v788_v33 = vsel %vm786_vm10, %v783_v42, %v1624_v21  ;;  %v1107_v16 = vsel %vm824_vm1, %v2058_v45, %v1105_v30 }
 0x264   :  { %1321 = vmatprep.subr.mxu0 %v788_v33  ;;  %1388 = vmatprep.subr.mxu1 %v1107_v16  ;;  %v2274_v33 = vsub.s32 2, %v2271_v56 }
 0x265   :  { %1322 = vmatpush1.msra.mxu0 %v787_v51  ;;  %1389 = vmatpush1.msra.mxu1 %v2064_v47 }
 0x266   :  { %v1067_v37 = vpop.permute.xlu1 %1066  ;;  %v764_v44 = vpop.permute.xlu0 %763 }
 0x267   :  { %v768_v32 = vsel %vm767_vm11, %v2070_v50, %v764_v44  ;;  %v769_v48 = vsel %vm767_vm11, %v764_v44, %v1629_v49  ;;  %v1630_v50 = vunpack.i.h.bf16 %v2004_v24  ;;  %v1071_v22 = vsel %vm786_vm10, %v1067_v37, %v1625_v31 }
 0x268   :  { %1323 = vmatprep.subr.mxu0 %v769_v48  ;;  %v1070_v17 = vsel %vm786_vm10, %v2085_v59, %v1067_v37  ;;  %v2275_v44 = vsub.s32 3, %v2271_v56 }
 0x269   :  { %1324 = vmatpush1.msra.mxu0 %v768_v32 }
 0x26a   :  { %v1049_v45 = vpop.permute.xlu1 %1048  ;;  %v1085_v41 = vpop.permute.xlu0 %1084  ;;  %1325 = vmatprep.subr.mxu0 %v1933_v8 }
 0x26b   :  { %v1088_v47 = vsel %vm805_vm9, %v2077_v54, %v1085_v41  ;;  %1326 = vmatpush1.msra.mxu0 %v1865_v62  ;;  %v1089_v6 = vsel %vm805_vm9, %v1085_v41, %v1620_v52  ;;  %v1053_v62 = vsel %vm767_vm11, %v1049_v45, %v1630_v50  ;;  %v1639_v54 = vunpack.i.l.bf16 %v2014_v27 }
 0x26c   :  { %1390 = vmatprep.subr.mxu1 %v1089_v6  ;;  %v1052_v24 = vsel %vm767_vm11, %v2083_v58, %v1049_v45  ;;  %v707_v58 = vsel %vm706_vm13, %v1644_v10, %v2087_v60 }
 0x26d   :  { %1391 = vmatpush1.msra.mxu1 %v1088_v47 }
 0x26e   :  { %v724_v36 = vpop.permute.xlu1 %723  ;;  %v743_v8 = vpop.permute.xlu0 %742  ;;  %1392 = vmatprep.subr.mxu1 %v1071_v22 }
 0x26f   :  { %1393 = vmatpush1.msra.mxu1 %v1070_v17  ;;  %v746_v23 = vsel %vm744_vm2, %v2075_v53, %v743_v8  ;;  %v727_v59 = vsel %vm725_vm12, %v2089_v61, %v724_v36  ;;  %v726_v53 = vsel %vm725_vm12, %v1639_v54, %v2089_v61 }
 0x270   :  { %1327 = vmatprep.subr.mxu0 %v746_v23  ;;  %1394 = vmatprep.subr.mxu1 %v1053_v62 }
 0x271   :  { %1328 = vmatpush1.msra.mxu0 %v2081_v55  ;;  %1395 = vmatpush1.msra.mxu1 %v1052_v24 }
 0x272   :  { %v686_v11 = vpop.permute.xlu1 %685  ;;  %v705_v39 = vpop.permute.xlu0 %704  ;;  %1329 = vmatprep.subr.mxu0 %v727_v59  ;;  %1396 = vmatprep.subr.mxu1 %v1946_v13  ;;  %v1635_v13 = vunpack.i.h.bf16 %v2006_v25 }
 0x273   :  { %1330 = vmatpush1.msra.mxu0 %v726_v53  ;;  %1397 = vmatpush1.msra.mxu1 %v1876_v3  ;;  %v708_v55 = vsel %vm706_vm13, %v2087_v60, %v705_v39  ;;  %v689_v61 = vsel %vm687_vm14, %v2093_v1, %v686_v11  ;;  %v688_v3 = vsel %vm687_vm14, %v2020_v29, %v2093_v1  ;;  %v1645_v29 = vunpack.i.h.bf16 %v2012_v26 }
 0x274   :  { %1331 = vmatprep.subr.mxu0 %v708_v55  ;;  %v1030_v12 = vsel %vm744_vm2, %v1635_v13, %v2091_v0  ;;  %v1012_v1 = vsel %vm725_vm12, %v1640_v7, %v2097_v5 }
 0x275   :  { %1332 = vmatpush1.msra.mxu0 %v707_v58 }
 0x276   :  { %v1011_v28 = vpop.permute.xlu1 %1010  ;;  %v1029_v38 = vpop.permute.xlu0 %1028  ;;  %1333 = vmatprep.subr.mxu0 %v689_v61 }
 0x277   :  { %1334 = vmatpush1.msra.mxu0 %v688_v3  ;;  %v1031_v60 = vsel %vm744_vm2, %v2091_v0, %v1029_v38  ;;  %v1013_v25 = vsel %vm725_vm12, %v2097_v5, %v1011_v28  ;;  %v994_v0 = vsel %vm706_vm13, %v1645_v29, %v2095_v2  ;;  %v1445_v5 = vld [vmem:[%s2261_s4] sm:$0xf]  ;;  %vm1494_vm2 = vcmask 1043456  }
 0x278   :  { %1398 = vmatprep.subr.mxu1 %v1031_v60  ;;  %1368 = vmatmul.mubr.f32.vlgmr.msra.gmra.mxu0 %v1238_v35  ;;  %vm1446_vm15 = vcmp.gt.f32.partialorder %v1445_v5, 0.5 }
 0x279   :  { %1399 = vmatpush1.msra.mxu1 %v1030_v12  ;;  %v1447_v40 = vsel %vm1446_vm15, 1, %v1666_v18 }
 0x27a   :  { %v973_v34 = vpop.permute.xlu1 %972  ;;  %v993_v20 = vpop.permute.xlu0 %992  ;;  %1400 = vmatprep.subr.mxu1 %v1013_v25  ;;  %v1455_v19 = vrot.slane %v1447_v40, %v2273_v63  ;;  %v1459_v16 = vrot.slane %v1447_v40, %v2274_v33  ;;  %v1463_v32 = vrot.slane %v1447_v40, %v2275_v44 }
 0x27b   :  { %1401 = vmatpush1.msra.mxu1 %v1012_v1  ;;  %v995_v27 = vsel %vm706_vm13, %v2095_v2, %v993_v20  ;;  %v2272_v2 = vsub.s32 0, %v2271_v56 }
 0x27c   :  { %1402 = vmatprep.subr.mxu1 %v995_v27  ;;  %vm1465_vm1 = vcmp.eq.s32.totalorder %v1455_v19, 1  ;;  %vm1466_vm3 = vcmp.eq.s32.totalorder %v1459_v16, 1  ;;  %vm1467_vm4 = vcmp.eq.s32.totalorder %v1463_v32, 1 }
 0x27d   :  { %1403 = vmatpush1.msra.mxu1 %v994_v0  ;;  %v1451_v57 = vrot.slane %v1447_v40, %v2272_v2 }
 0x27e   :  { %v971_v9 = vpop.permute.xlu1 %970  ;;  %v975_v43 = vpop.permute.xlu0 %974 }
 0x27f   :  { %v976_v4 = vsel %vm687_vm14, %v971_v9, %v973_v34  ;;  %v977_v26 = vsel %vm687_vm14, %v973_v34, %v975_v43  ;;  %vm1464_vm0 = vcmp.eq.s32.totalorder %v1451_v57, 1 }
 0x280   :  { %1404 = vmatprep.subr.mxu1 %v977_v26 }
 0x281   :  { %1405 = vmatpush1.msra.mxu1 %v976_v4 }
 0x282   :  { %1439 = vmatmul.mubr.f32.vlgmr.msra.gmra.mxu1 %v1238_v35 }
 0x338   :  { %v1369_v46 = vpop.f32.mrf.mxu0 }
 0x339   :  { %v1472_v14 = vrot.slane %v1369_v46, 4 }
 0x33a   :  { %v1371_v15 = vpop.f32.mrf.mxu0 }
 0x33b   :  { %v1480_v21 = vsel %vm1464_vm0, %v1369_v46, %v1472_v14  ;;  %v1473_v42 = vrot.slane %v1371_v15, 4 }
 0x33c   :  { %v1504_v49 = vmul.f32 %v1480_v21, %v1480_v21  ;;  %v1495_v48 = vsel %vm1494_vm2, %v1480_v21, 0.0 }
 0x33d   :  { %v1481_v30 = vsel %vm1465_vm1, %v1371_v15, %v1473_v42 }
 0x33e   :  { %v1488_v51 = vcombine.low %v1480_v21, %v1481_v30  ;;  %v1505_v37 = vmul.f32 %v1481_v30, %v1481_v30  ;;  %v1496_v52 = vsel %vm1494_vm2, %v1481_v30, 0.0  ;;  %v1508_v31 = vsel %vm1494_vm2, %v1504_v49, 0.0 }
 0x33f   :  { %v1497_v50 = vadd.f32 %v1496_v52, %v1495_v48 }
 0x340   :  { %1492 = vst [vmem:[%s2262_s5] sm:$0xff] %v1488_v51  ;;  %v1509_v47 = vsel %vm1494_vm2, %v1505_v37, 0.0 }
 0x341   :  { %v1510_v23 = vadd.f32 %v1509_v47, %v1508_v31 }
 0x342   :  { %v1440_v45 = vpop.f32.mrf.mxu1 }
 0x343   :  { %v1474_v41 = vrot.slane %v1440_v45, 4 }
 0x344   :  { %v1442_v6 = vpop.f32.mrf.mxu1 }
 0x345   :  { %v1482_v22 = vsel %vm1466_vm3, %v1440_v45, %v1474_v41  ;;  %v1475_v17 = vrot.slane %v1442_v6, 4 }
 0x346   :  { %v1498_v36 = vsel %vm1494_vm2, %v1482_v22, 0.0  ;;  %v1506_v8 = vmul.f32 %v1482_v22, %v1482_v22 }
 0x347   :  { %v1499_v62 = vadd.f32 %v1498_v36, %v1497_v50  ;;  %v1483_v54 = vsel %vm1467_vm4, %v1442_v6, %v1475_v17 }
 0x348   :  { %v1511_v24 = vsel %vm1494_vm2, %v1506_v8, 0.0  ;;  %v1489_v59 = vcombine.low %v1482_v22, %v1483_v54  ;;  %v1500_v10 = vsel %vm1494_vm2, %v1483_v54, 0.0  ;;  %v1507_v53 = vmul.f32 %v1483_v54, %v1483_v54 }
 0x349   :  { %v1501_v11 = vadd.f32 %v1500_v10, %v1499_v62  ;;  %v1512_v39 = vadd.f32 %v1511_v24, %v1510_v23 }
 0x34a   :  { %1493 = vst [vmem:[%s2262_s5 + $0x8] sm:$0xff] %v1489_v59  ;;  %v1513_v55 = vsel %vm1494_vm2, %v1507_v53, 0.0 }
 0x34b   :  { %1502 = vadd.xlane.f32.xlu0 %v1501_v11  ;;  %v1514_v58 = vadd.f32 %v1513_v55, %v1512_v39 }
 0x34d   :  { %1515 = vadd.xlane.f32.xlu1 %v1514_v58 }
 0x3d4   :  { %v1503_v61 = vpop.xlane.xlu0 %1502 }
 0x3d6   :  { %v1516_v35 = vpop.xlane.xlu1 %1515 }
 0x3d7   :  { %v1518_v13 = vsel %vm1517_vm5, %v1503_v61, %v1516_v35 }
 0x3d8   :  { %1520 = vst.msk [vmem:[%s2263_s6] sm:$0xf] %vm1519_vm6, %v1518_v13 }

</bundles_post_ra>
